<compile_context>
chip_gen: v5e
topology: v5e:2x2
jax: 0.10.0
libtpu: 0.0.40
codegen_flags: <defaults>
</compile_context>

<pallas_src>
import jax
import jax.numpy as jnp
from jax.experimental import pallas as pl
from jax.experimental.pallas import tpu as pltpu


def _make_cab_kernel(L, C, K):
    pad = K // 2
    Le = L + 2 * pad  # conv #1 is evaluated at L + 2*pad positions

    def kernel(x_ref, w1_ref, b1_ref, w2_ref, b2_ref,
               wd_ref, bd_ref, wut_ref, bu_ref, alpha_ref,
               res_ref, y_ref):
        # x_ref : (L + 4*pad, C) f32   (one batch element, seq pre-padded by 2*pad)
        # w1_ref, w2_ref : (K*C, C) bf16 flattened conv weights (taps stacked)
        # b1_ref, b2_ref, bu_ref : (1, C) f32 ; wd_ref, wut_ref : (Cr, C) f32
        # bd_ref : (Cr, 1) f32 ; alpha_ref : (1,) f32 in SMEM (PReLU slope)
        # res_ref: (C, L) f32 ; y_ref: (1, C) f32
        xp = x_ref[...]                                   # (L + 4*pad, C)
        alpha = alpha_ref[0]                              # PReLU slope (scalar)

        # ---- body conv #1: one fused K-tap matmul, evaluated on the extended
        #      window (taps are aligned 128-lane-wide concatenations; the row
        #      shifts are plain sublane slices of a value).
        x1 = jnp.concatenate([xp[k:k + Le, :] for k in range(K)], axis=1)   # (Le, K*C)
        h1 = jnp.dot(x1.astype(jnp.bfloat16), w1_ref[...],
                     preferred_element_type=jnp.float32)                    # (Le, C) f32
        h1 = h1 + b1_ref[...]
        h1 = jnp.where(h1 >= 0.0, h1, alpha * h1)         # act = PReLU
        # Rows evaluated over the zero padding are masked to zero so that they
        # serve as conv #2's zero padding (padding handled in-kernel).
        row = jax.lax.broadcasted_iota(jnp.int32, (Le, 1), 0)
        h1 = jnp.where((row >= pad) & (row < pad + L), h1, 0.0)

        # ---- body conv #2: same fused K-tap matmul on the masked h1.
        x2 = jnp.concatenate([h1[k:k + L, :] for k in range(K)], axis=1)    # (L, K*C)
        h2 = jnp.dot(x2.astype(jnp.bfloat16), w2_ref[...],
                     preferred_element_type=jnp.float32)                    # (L, C) f32
        h2 = h2 + b2_ref[...]

        # ---- CALayer: global average pool over L + two 1x1 convs + sigmoid.
        #      (tiny; done with VPU broadcasts + XLU reductions, no skinny matmuls)
        pooled = jnp.mean(h2, axis=0, keepdims=True)                        # (1, C)
        z = jnp.sum(wd_ref[...] * pooled, axis=1, keepdims=True) + bd_ref[...]   # (Cr, 1)
        z = jnp.maximum(z, 0.0)
        y = jnp.sum(wut_ref[...] * z, axis=0, keepdims=True) + bu_ref[...]       # (1, C)
        y = jax.nn.sigmoid(y)

        # ---- channel re-scale + residual, then lane-dense (C, L) store.
        res = h2 * y + xp[2 * pad:2 * pad + L, :]                           # (L, C)
        res_ref[...] = jnp.transpose(res).astype(res_ref.dtype)             # (C, L)
        y_ref[...] = y.astype(y_ref.dtype)                                  # (1, C)

    return kernel


def cab_forward(x, w1, b1, w2, b2, wd, bd, wu, bu, prelu_alpha):
    """CAB forward.

    x: (B, L, C) f32; w1, w2: (C, C, K) torch Conv1d weights; b1, b2: (C,);
    wd: (C//r, C, 1); bd: (C//r,); wu: (C, C//r, 1); bu: (C,);
    prelu_alpha: scalar PReLU slope (the module's `act`).
    Returns (res (B, C, L), y (B, C, 1)) - same as the PyTorch module.
    """
    B, L, C = x.shape
    C_out, C_in, K = w1.shape
    assert C_out == C and C_in == C and w2.shape == (C, C, K)
    Cr = wd.shape[0]
    pad = K // 2
    Lp = L + 4 * pad

    # One small host-side zero-pad of the sequence axis (by 2*pad): conv #1 is
    # then evaluated on an extended window so conv #2's padding can be produced
    # in-kernel by masking (no second pad, no unaligned in-kernel shifts).
    xp = jnp.pad(x, ((0, 0), (2 * pad, 2 * pad), (0, 0)))         # (B, Lp, C)

    # Conv weights flattened so the K taps form one fused K*C contraction,
    # cast to bf16 for the MXU (accumulation stays f32 inside the kernel).
    w1f = jnp.transpose(w1, (2, 1, 0)).reshape(K * C, C).astype(jnp.bfloat16)
    w2f = jnp.transpose(w2, (2, 1, 0)).reshape(K * C, C).astype(jnp.bfloat16)
    b1r = b1.reshape(1, C).astype(jnp.float32)
    b2r = b2.reshape(1, C).astype(jnp.float32)

    wd2 = wd[:, :, 0].astype(jnp.float32)                         # (Cr, C)
    bdc = bd.reshape(Cr, 1).astype(jnp.float32)
    wut = jnp.transpose(wu[:, :, 0]).astype(jnp.float32)          # (Cr, C)
    bur = bu.reshape(1, C).astype(jnp.float32)
    alpha = jnp.asarray([prelu_alpha], dtype=jnp.float32)         # -> SMEM scalar

    kernel = _make_cab_kernel(L, C, K)

    res, y = pl.pallas_call(
        kernel,
        out_shape=(jax.ShapeDtypeStruct((B, C, L), jnp.float32),
                   jax.ShapeDtypeStruct((B, 1, C), jnp.float32)),
        grid_spec=pltpu.PrefetchScalarGridSpec(
            num_scalar_prefetch=0,
            grid=(B,),
            in_specs=[
                pl.BlockSpec((None, Lp, C), lambda b: (b, 0, 0)),   # x (padded)
                pl.BlockSpec((K * C, C), lambda b: (0, 0)),         # W1 (flattened)
                pl.BlockSpec((1, C), lambda b: (0, 0)),             # b1
                pl.BlockSpec((K * C, C), lambda b: (0, 0)),         # W2 (flattened)
                pl.BlockSpec((1, C), lambda b: (0, 0)),             # b2
                pl.BlockSpec((Cr, C), lambda b: (0, 0)),            # Wd (CA down)
                pl.BlockSpec((Cr, 1), lambda b: (0, 0)),            # bd
                pl.BlockSpec((Cr, C), lambda b: (0, 0)),            # Wu^T (CA up)
                pl.BlockSpec((1, C), lambda b: (0, 0)),             # bu
                pl.BlockSpec(memory_space=pltpu.MemorySpace.SMEM),  # PReLU slope
            ],
            out_specs=(
                pl.BlockSpec((None, C, L), lambda b: (b, 0, 0)),    # res (lane-dense L)
                pl.BlockSpec((None, 1, C), lambda b: (b, 0, 0)),    # y   (lane-dense C)
            ),
        ),
        compiler_params=pltpu.CompilerParams(
            dimension_semantics=("parallel",),
        ),
    )(xp, w1f, b1r, w2f, b2r, wd2, bdc, wut, bur, alpha)

    # (B, 1, C) -> (B, C, 1) is a pure (free) reshape; matches torch's y shape.
    return res, y.reshape(B, C, 1)


def _reference(x, w1, b1, w2, b2, wd, bd, wu, bu, alpha):
    """Pure-JAX mirror of the PyTorch CAB forward (with the same bf16 rounding
    of the conv matmul operands that the kernel applies for the MXU)."""
    f32 = jnp.float32
    hi = jax.lax.Precision.HIGHEST

    def bf16_round(a):
        return a.astype(jnp.bfloat16).astype(f32)

    x_ncl = jnp.transpose(x, (0, 2, 1))                           # (B, C, L)

    def conv1d(inp, w, b):
        p = w.shape[-1] // 2
        out = jax.lax.conv_general_dilated(
            bf16_round(inp), bf16_round(w),
            window_strides=(1,), padding=((p, p),),
            dimension_numbers=("NCH", "OIH", "NCH"),
            precision=hi)
        return out + b[None, :, None]

    h1 = conv1d(x_ncl, w1, b1)
    h1 = jnp.where(h1 >= 0.0, h1, alpha * h1)                     # PReLU
    h2 = conv1d(h1, w2, b2)

    pooled = jnp.mean(h2, axis=2, keepdims=True)                  # (B, C, 1)
    z = jnp.einsum("oc,bcl->bol", wd[:, :, 0], pooled, precision=hi) + bd[None, :, None]
    z = jnp.maximum(z, 0.0)
    y = jnp.einsum("oc,bcl->bol", wu[:, :, 0], z, precision=hi) + bu[None, :, None]
    y = jax.nn.sigmoid(y)

    res = h2 * y + x_ncl
    return res, y


if __name__ == "__main__":
    B, L, n_feat = 2, 128, 128
    kernel_size, reduction = 3, 16
    Cr = n_feat // reduction

    key = jax.random.PRNGKey(0)
    ks = jax.random.split(key, 9)
    x = jax.random.normal(ks[0], (B, L, n_feat), dtype=jnp.float32)
    # Deterministic synthetic parameters (torch Conv1d layouts).
    w1 = jax.random.normal(ks[1], (n_feat, n_feat, kernel_size), jnp.float32) * 0.05
    b1 = jax.random.normal(ks[2], (n_feat,), jnp.float32) * 0.05
    w2 = jax.random.normal(ks[3], (n_feat, n_feat, kernel_size), jnp.float32) * 0.05
    b2 = jax.random.normal(ks[4], (n_feat,), jnp.float32) * 0.05
    wd = jax.random.normal(ks[5], (Cr, n_feat, 1), jnp.float32) * 0.05
    bd = jax.random.normal(ks[6], (Cr,), jnp.float32) * 0.05
    wu = jax.random.normal(ks[7], (n_feat, Cr, 1), jnp.float32) * 0.05
    bu = jax.random.normal(ks[8], (n_feat,), jnp.float32) * 0.05
    alpha = 0.25  # nn.PReLU() default slope (the module's `act`)

    res, y = cab_forward(x, w1, b1, w2, b2, wd, bd, wu, bu, alpha)
    res, y = jax.block_until_ready((res, y))

    res_ref, y_ref = _reference(x, w1, b1, w2, b2, wd, bd, wu, bu, alpha)
    assert res.shape == (B, n_feat, L), res.shape
    assert y.shape == (B, n_feat, 1), y.shape
    assert jnp.allclose(res, res_ref, atol=2e-3, rtol=2e-3), (
        float(jnp.max(jnp.abs(res - res_ref))))
    assert jnp.allclose(y, y_ref, atol=2e-3, rtol=2e-3), (
        float(jnp.max(jnp.abs(y - y_ref))))

    print("KERNEL_OK")
</pallas_src>

<mosaic_0001>
module attributes {stable_mosaic.version = 11 : i64} {
  func.func @kernel(%arg0: i32, %arg1: memref<1x132x128xf32, #tpu.memory_space<vmem>>, %arg2: memref<384x128xbf16, #tpu.memory_space<vmem>>, %arg3: memref<1x128xf32, #tpu.memory_space<vmem>>, %arg4: memref<384x128xbf16, #tpu.memory_space<vmem>>, %arg5: memref<1x128xf32, #tpu.memory_space<vmem>>, %arg6: memref<8x128xf32, #tpu.memory_space<vmem>>, %arg7: memref<8x1xf32, #tpu.memory_space<vmem>>, %arg8: memref<8x128xf32, #tpu.memory_space<vmem>>, %arg9: memref<1x128xf32, #tpu.memory_space<vmem>>, %arg10: memref<1xf32, #tpu.memory_space<smem>>, %arg11: memref<1x128x128xf32, #tpu.memory_space<vmem>>, %arg12: memref<1x1x128xf32, #tpu.memory_space<vmem>>) attributes {dimension_semantics = [#tpu.dimension_semantics<parallel>], iteration_bounds = array<i64: 2>, scalar_prefetch = 0 : i64, scratch_operands = 0 : i64, tpu.core_type = #tpu.core_type<tc>, window_params = [{transform_indices = @transform_0, window_bounds = array<i64: 1, 132, 128>}, {pipeline_mode = #tpu.pipeline_mode<synchronous>, transform_indices = @transform_1, window_bounds = array<i64: 384, 128>}, {pipeline_mode = #tpu.pipeline_mode<synchronous>, transform_indices = @transform_2, window_bounds = array<i64: 1, 128>}, {pipeline_mode = #tpu.pipeline_mode<synchronous>, transform_indices = @transform_3, window_bounds = array<i64: 384, 128>}, {pipeline_mode = #tpu.pipeline_mode<synchronous>, transform_indices = @transform_4, window_bounds = array<i64: 1, 128>}, {pipeline_mode = #tpu.pipeline_mode<synchronous>, transform_indices = @transform_5, window_bounds = array<i64: 8, 128>}, {pipeline_mode = #tpu.pipeline_mode<synchronous>, transform_indices = @transform_6, window_bounds = array<i64: 8, 1>}, {pipeline_mode = #tpu.pipeline_mode<synchronous>, transform_indices = @transform_7, window_bounds = array<i64: 8, 128>}, {pipeline_mode = #tpu.pipeline_mode<synchronous>, transform_indices = @transform_8, window_bounds = array<i64: 1, 128>}, {transform_indices = @transform_9, window_bounds = array<i64: 1>}, {transform_indices = @transform_10, window_bounds = array<i64: 1, 128, 128>}, {transform_indices = @transform_11, window_bounds = array<i64: 1, 1, 128>}]} {
    %c0 = arith.constant 0 : index
    %c0_0 = arith.constant 0 : index
    %c0_1 = arith.constant 0 : index
    %0 = vector.load %arg1[%c0, %c0_0, %c0_1] : memref<1x132x128xf32, #tpu.memory_space<vmem>>, vector<1x132x128xf32>
    %1 = vector.shape_cast %0 : vector<1x132x128xf32> to vector<132x128xf32>
    %c0_2 = arith.constant 0 : index
    %2 = memref.load %arg10[%c0_2] : memref<1xf32, #tpu.memory_space<smem>>
    %3 = vector.extract_strided_slice %1 {offsets = [0, 0], sizes = [130, 128], strides = [1, 1]} : vector<132x128xf32> to vector<130x128xf32>
    %4 = vector.extract_strided_slice %1 {offsets = [1, 0], sizes = [130, 128], strides = [1, 1]} : vector<132x128xf32> to vector<130x128xf32>
    %5 = vector.extract_strided_slice %1 {offsets = [2, 0], sizes = [130, 128], strides = [1, 1]} : vector<132x128xf32> to vector<130x128xf32>
    %6 = tpu.concatenate %3, %4, %5 in 1 : vector<130x128xf32>, vector<130x128xf32>, vector<130x128xf32> -> vector<130x384xf32>
    %7 = arith.truncf %6 : vector<130x384xf32> to vector<130x384xbf16>
    %c0_3 = arith.constant 0 : index
    %c0_4 = arith.constant 0 : index
    %8 = vector.load %arg2[%c0_3, %c0_4] : memref<384x128xbf16, #tpu.memory_space<vmem>>, vector<384x128xbf16>
    %cst = arith.constant dense<0.000000e+00> : vector<130x128xf32>
    %9 = tpu.matmul %7, %8, %cst {dimension_numbers = #tpu.dot_dimension_numbers<[1], [0], [0], [1], [0, 0, 1, 1], [], []>} : vector<130x384xbf16>, vector<384x128xbf16>, vector<130x128xf32> -> vector<130x128xf32>
    %c0_5 = arith.constant 0 : index
    %c0_6 = arith.constant 0 : index
    %10 = vector.load %arg3[%c0_5, %c0_6] : memref<1x128xf32, #tpu.memory_space<vmem>>, vector<1x128xf32>
    %11 = vector.broadcast %10 : vector<1x128xf32> to vector<130x128xf32>
    %12 = arith.addf %9, %11 : vector<130x128xf32>
    %cst_7 = arith.constant 0.000000e+00 : f32
    %13 = vector.broadcast %cst_7 : f32 to vector<130x128xf32>
    %14 = arith.cmpf oge, %12, %13 : vector<130x128xf32>
    %15 = vector.broadcast %2 : f32 to vector<130x128xf32>
    %16 = arith.mulf %15, %12 : vector<130x128xf32>
    %17 = arith.select %14, %12, %16 : vector<130x128xi1>, vector<130x128xf32>
    %18 = tpu.iota {dimensions = array<i32: 0>} : vector<130x1xi32>
    %c1_i32 = arith.constant 1 : i32
    %19 = vector.broadcast %c1_i32 : i32 to vector<130x1xi32>
    %20 = arith.cmpi sge, %18, %19 : vector<130x1xi32>
    %c129_i32 = arith.constant 129 : i32
    %21 = vector.broadcast %c129_i32 : i32 to vector<130x1xi32>
    %22 = arith.cmpi slt, %18, %21 : vector<130x1xi32>
    %23 = arith.andi %20, %22 : vector<130x1xi1>
    %cst_8 = arith.constant 0.000000e+00 : f32
    %24 = vector.shape_cast %23 : vector<130x1xi1> to vector<130x1xi1>
    %25 = vector.broadcast %24 : vector<130x1xi1> to vector<130x128xi1>
    %26 = vector.broadcast %cst_8 : f32 to vector<130x128xf32>
    %27 = arith.select %25, %17, %26 : vector<130x128xi1>, vector<130x128xf32>
    %28 = vector.extract_strided_slice %27 {offsets = [0, 0], sizes = [128, 128], strides = [1, 1]} : vector<130x128xf32> to vector<128x128xf32>
    %29 = vector.extract_strided_slice %27 {offsets = [1, 0], sizes = [128, 128], strides = [1, 1]} : vector<130x128xf32> to vector<128x128xf32>
    %30 = vector.extract_strided_slice %27 {offsets = [2, 0], sizes = [128, 128], strides = [1, 1]} : vector<130x128xf32> to vector<128x128xf32>
    %31 = tpu.concatenate %28, %29, %30 in 1 : vector<128x128xf32>, vector<128x128xf32>, vector<128x128xf32> -> vector<128x384xf32>
    %32 = arith.truncf %31 : vector<128x384xf32> to vector<128x384xbf16>
    %c0_9 = arith.constant 0 : index
    %c0_10 = arith.constant 0 : index
    %33 = vector.load %arg4[%c0_9, %c0_10] : memref<384x128xbf16, #tpu.memory_space<vmem>>, vector<384x128xbf16>
    %cst_11 = arith.constant dense<0.000000e+00> : vector<128x128xf32>
    %34 = tpu.matmul %32, %33, %cst_11 {dimension_numbers = #tpu.dot_dimension_numbers<[1], [0], [0], [1], [0, 0, 1, 1], [], []>} : vector<128x384xbf16>, vector<384x128xbf16>, vector<128x128xf32> -> vector<128x128xf32>
    %c0_12 = arith.constant 0 : index
    %c0_13 = arith.constant 0 : index
    %35 = vector.load %arg5[%c0_12, %c0_13] : memref<1x128xf32, #tpu.memory_space<vmem>>, vector<1x128xf32>
    %36 = vector.broadcast %35 : vector<1x128xf32> to vector<128x128xf32>
    %37 = arith.addf %34, %36 : vector<128x128xf32>
    %cst_14 = arith.constant dense<0.000000e+00> : vector<128xf32>
    %38 = vector.multi_reduction <add>, %37, %cst_14 [0] : vector<128x128xf32> to vector<128xf32>
    %39 = vector.shape_cast %38 : vector<128xf32> to vector<1x128xf32>
    %cst_15 = arith.constant 1.280000e+02 : f32
    %40 = vector.broadcast %cst_15 : f32 to vector<1x128xf32>
    %41 = arith.divf %39, %40 : vector<1x128xf32>
    %c0_16 = arith.constant 0 : index
    %c0_17 = arith.constant 0 : index
    %42 = vector.load %arg6[%c0_16, %c0_17] : memref<8x128xf32, #tpu.memory_space<vmem>>, vector<8x128xf32>
    %43 = vector.broadcast %41 : vector<1x128xf32> to vector<8x128xf32>
    %44 = arith.mulf %42, %43 : vector<8x128xf32>
    %cst_18 = arith.constant dense<0.000000e+00> : vector<8xf32>
    %45 = vector.multi_reduction <add>, %44, %cst_18 [1] : vector<8x128xf32> to vector<8xf32>
    %46 = vector.shape_cast %45 : vector<8xf32> to vector<8x1xf32>
    %c0_19 = arith.constant 0 : index
    %c0_20 = arith.constant 0 : index
    %47 = vector.load %arg7[%c0_19, %c0_20] : memref<8x1xf32, #tpu.memory_space<vmem>>, vector<8x1xf32>
    %48 = arith.addf %46, %47 : vector<8x1xf32>
    %cst_21 = arith.constant 0.000000e+00 : f32
    %49 = vector.broadcast %cst_21 : f32 to vector<8x1xf32>
    %50 = arith.maximumf %48, %49 : vector<8x1xf32>
    %c0_22 = arith.constant 0 : index
    %c0_23 = arith.constant 0 : index
    %51 = vector.load %arg8[%c0_22, %c0_23] : memref<8x128xf32, #tpu.memory_space<vmem>>, vector<8x128xf32>
    %52 = vector.broadcast %50 : vector<8x1xf32> to vector<8x128xf32>
    %53 = arith.mulf %51, %52 : vector<8x128xf32>
    %cst_24 = arith.constant dense<0.000000e+00> : vector<128xf32>
    %54 = vector.multi_reduction <add>, %53, %cst_24 [0] : vector<8x128xf32> to vector<128xf32>
    %55 = vector.shape_cast %54 : vector<128xf32> to vector<1x128xf32>
    %c0_25 = arith.constant 0 : index
    %c0_26 = arith.constant 0 : index
    %56 = vector.load %arg9[%c0_25, %c0_26] : memref<1x128xf32, #tpu.memory_space<vmem>>, vector<1x128xf32>
    %57 = arith.addf %55, %56 : vector<1x128xf32>
    %58 = arith.negf %57 : vector<1x128xf32>
    %59 = math.exp %58 : vector<1x128xf32>
    %cst_27 = arith.constant 1.000000e+00 : f32
    %60 = vector.broadcast %cst_27 : f32 to vector<1x128xf32>
    %61 = arith.addf %60, %59 : vector<1x128xf32>
    %62 = arith.divf %60, %61 : vector<1x128xf32>
    %63 = vector.broadcast %62 : vector<1x128xf32> to vector<128x128xf32>
    %64 = arith.mulf %37, %63 : vector<128x128xf32>
    %65 = vector.extract_strided_slice %1 {offsets = [2, 0], sizes = [128, 128], strides = [1, 1]} : vector<132x128xf32> to vector<128x128xf32>
    %66 = arith.addf %64, %65 : vector<128x128xf32>
    %67 = tpu.transpose %66, [1, 0] : vector<128x128xf32> -> vector<128x128xf32>
    %c0_28 = arith.constant 0 : index
    %c0_29 = arith.constant 0 : index
    %c0_30 = arith.constant 0 : index
    %68 = vector.load %arg11[%c0_28, %c0_29, %c0_30] : memref<1x128x128xf32, #tpu.memory_space<vmem>>, vector<1x128x128xf32>
    %69 = vector.shape_cast %68 : vector<1x128x128xf32> to vector<128x128xf32>
    %70 = vector.shape_cast %67 : vector<128x128xf32> to vector<1x128x128xf32>
    tpu.vector_store %arg11[%c0_28, %c0_29, %c0_30], %70 {strides = array<i32>} : memref<1x128x128xf32, #tpu.memory_space<vmem>>, vector<1x128x128xf32>,
    %c0_31 = arith.constant 0 : index
    %c0_32 = arith.constant 0 : index
    %c0_33 = arith.constant 0 : index
    %71 = vector.load %arg12[%c0_31, %c0_32, %c0_33] : memref<1x1x128xf32, #tpu.memory_space<vmem>>, vector<1x1x128xf32>
    %72 = vector.shape_cast %71 : vector<1x1x128xf32> to vector<1x128xf32>
    %73 = vector.shape_cast %62 : vector<1x128xf32> to vector<1x1x128xf32>
    tpu.vector_store %arg12[%c0_31, %c0_32, %c0_33], %73 {strides = array<i32>} : memref<1x1x128xf32, #tpu.memory_space<vmem>>, vector<1x1x128xf32>,
    return
  }
  func.func @transform_0(%arg0: i32) -> (i32, i32, i32) {
    %c0_i32 = arith.constant 0 : i32
    %c0_i32_0 = arith.constant 0 : i32
    %c0_i32_1 = arith.constant 0 : i32
    return %arg0, %c0_i32, %c0_i32_0 : i32, i32, i32
  }
  func.func @transform_1(%arg0: i32) -> (i32, i32) {
    %c0_i32 = arith.constant 0 : i32
    %c0_i32_0 = arith.constant 0 : i32
    %c0_i32_1 = arith.constant 0 : i32
    return %c0_i32, %c0_i32_0 : i32, i32
  }
  func.func @transform_2(%arg0: i32) -> (i32, i32) {
    %c0_i32 = arith.constant 0 : i32
    %c0_i32_0 = arith.constant 0 : i32
    %c0_i32_1 = arith.constant 0 : i32
    return %c0_i32, %c0_i32_0 : i32, i32
  }
  func.func @transform_3(%arg0: i32) -> (i32, i32) {
    %c0_i32 = arith.constant 0 : i32
    %c0_i32_0 = arith.constant 0 : i32
    %c0_i32_1 = arith.constant 0 : i32
    return %c0_i32, %c0_i32_0 : i32, i32
  }
  func.func @transform_4(%arg0: i32) -> (i32, i32) {
    %c0_i32 = arith.constant 0 : i32
    %c0_i32_0 = arith.constant 0 : i32
    %c0_i32_1 = arith.constant 0 : i32
    return %c0_i32, %c0_i32_0 : i32, i32
  }
  func.func @transform_5(%arg0: i32) -> (i32, i32) {
    %c0_i32 = arith.constant 0 : i32
    %c0_i32_0 = arith.constant 0 : i32
    %c0_i32_1 = arith.constant 0 : i32
    return %c0_i32, %c0_i32_0 : i32, i32
  }
  func.func @transform_6(%arg0: i32) -> (i32, i32) {
    %c0_i32 = arith.constant 0 : i32
    %c0_i32_0 = arith.constant 0 : i32
    %c0_i32_1 = arith.constant 0 : i32
    return %c0_i32, %c0_i32_0 : i32, i32
  }
  func.func @transform_7(%arg0: i32) -> (i32, i32) {
    %c0_i32 = arith.constant 0 : i32
    %c0_i32_0 = arith.constant 0 : i32
    %c0_i32_1 = arith.constant 0 : i32
    return %c0_i32, %c0_i32_0 : i32, i32
  }
  func.func @transform_8(%arg0: i32) -> (i32, i32) {
    %c0_i32 = arith.constant 0 : i32
    %c0_i32_0 = arith.constant 0 : i32
    %c0_i32_1 = arith.constant 0 : i32
    return %c0_i32, %c0_i32_0 : i32, i32
  }
  func.func @transform_9(%arg0: i32) -> i32 {
    %c0_i32 = arith.constant 0 : i32
    %c0_i32_0 = arith.constant 0 : i32
    return %c0_i32 : i32
  }
  func.func @transform_10(%arg0: i32) -> (i32, i32, i32) {
    %c0_i32 = arith.constant 0 : i32
    %c0_i32_0 = arith.constant 0 : i32
    %c0_i32_1 = arith.constant 0 : i32
    return %arg0, %c0_i32, %c0_i32_0 : i32, i32, i32
  }
  func.func @transform_11(%arg0: i32) -> (i32, i32, i32) {
    %c0_i32 = arith.constant 0 : i32
    %c0_i32_0 = arith.constant 0 : i32
    %c0_i32_1 = arith.constant 0 : i32
    return %arg0, %c0_i32, %c0_i32_0 : i32, i32, i32
  }
}

</mosaic_0001>

<bundles_post_ra>
// kernel: tpu_custom_call.1
= control target key start
LH: loop header
LB: loop body
LE: loop exit
PB: predicated region body
PF: predicated region fallthrough
CT: control target
= control target key end

     0   :  { %s3090_s0 = inlined_call_operand.vmem [shape: f32[2,132,128], index: 0, kind: input, shape index: {}]   ;;  %s3091_s1 = inlined_call_operand.vmem [shape: bf16[384,128], index: 1, kind: input, shape index: {}]   ;;  %s3092_s2 = inlined_call_operand.vmem [shape: f32[1,128], index: 2, kind: input, shape index: {}]   ;;  %s3093_s3 = inlined_call_operand.vmem [shape: bf16[384,128], index: 3, kind: input, shape index: {}]   ;;  %s3094_s4 = inlined_call_operand.vmem [shape: f32[1,128], index: 4, kind: input, shape index: {}]   ;;  %s3095_s5 = inlined_call_operand.vmem [shape: f32[8,128], index: 5, kind: input, shape index: {}]   ;;  %s3096_s6 = inlined_call_operand.vmem [shape: f32[8,1], index: 6, kind: input, shape index: {}]   ;;  %s3097_s7 = inlined_call_operand.vmem [shape: f32[8,128], index: 7, kind: input, shape index: {}]   ;;  %s3098_s8 = inlined_call_operand.vmem [shape: f32[1,128], index: 8, kind: input, shape index: {}]   ;;  %s3099_s9 = inlined_call_operand.<no memory space> [shape: f32[1], index: 9, kind: input, shape index: {}]   ;;  %s3100_s10 = inlined_call_operand.hbm [shape: f32[2,128,128], index: 10, kind: output, shape index: {0}]   ;;  %s3101_s11 = inlined_call_operand.hbm [shape: f32[2,1,128], index: 11, kind: output, shape index: {1}]  }
   0x1   :  { %3106 = sst [smem:[#allocation13_spill]] %s3090_s0 }
   0x2   :  { %3107 = sst [smem:[#allocation14_spill]] %s3091_s1 }
   0x3   :  { %3108 = sst [smem:[#allocation15_spill]] %s3092_s2 }
   0x4   :  { %17 = sst [smem:[#allocation2]] %s3099_s9 }
   0x5   :  { %18 = vsyncpa [#allocation4], 0 }
   0x6   :  { %20 = vsyncpa [#allocation4 + $0x1], 0 }
   0x7   :  { %21 = vsyncpa [#allocation6], 0 }
   0x8   :  { %23 = vsyncpa [#allocation6 + $0x1], 0  ;;  %s2339_s19 = smov 0   ;;  %s2341_s20 = smov 0  }
   0x9   :  { %s2343_s21 = smov 0   ;;  %s2345_s22 = smov 0  }
   0xa LB: > { %s2360_s9 = sadd.s32 4294967295, %s2269_s22   ;;  %s1844_s23 = sadd.s32 4294967294, %s2269_s22   ;;  %s2269_s22 = sphi %s2345_s22, %s3125_s22   ;;  %s2265_s21 = sphi %s2343_s21, %s3124_s21   ;;  %s2261_s20 = sphi %s2341_s20, %s3123_s20   ;;  %s2257_s19 = sphi %s2339_s19, %s3122_s19  }
   0xb   : > { %s2364_s24 = sadd.s32 1, %s2269_s22   ;;  %s251_s25 = sadd.s32 1, %s2265_s21 }
   0xc   : > { %s248_s26 = ssub.s32 %s2269_s22, %s2364_s24  ;;  %p261_p0 = scmp.ne.s32.totalorder %s2265_s21, %s2261_s20 }
   0xd   : > { %p249_p1 = scmp.eq.s32.totalorder %s248_s26, 0  ;;  %p262_p2 = scmp.eq.s32.totalorder %s2360_s9, 1 }
   0xe   : > { %p267_p3 = scmp.ne.s32.totalorder %s2261_s20, %s2257_s19  ;;  %p268_p4 = scmp.eq.s32.totalorder %s1844_s23, 1 }
   0xf   : > { %s2375_s27 = scalar_select %p249_p1, %s2265_s21, %s251_s25  }
  0x10   : > { %p2377_p5 = por %p262_p2, %p261_p0  ;;  %p2381_p6 = por %p268_p4, %p267_p3 }
  0x11   : > { %p1847_p7 = scmp.ge.s32.totalorder %s2269_s22, 1  ;;  %p347_p8 = scmp.lt.s32.totalorder %s2269_s22, 3 }
  0x13   : > { %p348_p9 = pnand %p1847_p7, %p347_p8 }
  0x15   : > { %351 = sbr.rel (%p348_p9) target bundleno = 1247 (0x4df), region = 60 }
  0x1a   : > { %s3111_s1 = sld [smem:[#allocation14_spill]]  ;;  %p391_p10 = scmp.lt.s32.totalorder %s2360_s9, 1  ;;  %vm482_vm0 = vcmask 1045504   ;;  %vm431_vm1 = vcmask 1046528   ;;  %vm2271_vm5 = vmmov 1  }
  0x1b   : > { %s3112_s0 = sld [smem:[#allocation13_spill]] }
  0x1c   : > { %s392_s26 = scalar_select %p391_p10, %s2360_s9, 1 }
  0x1d   : > { %s3117_s2 = sld [smem:[#allocation15_spill]] }
  0x1e   : > { %s2116_s15 = smul.u32 136, %s392_s26  ;;  %s413_s26 = sld [smem:[#allocation2]] }
  0x20   : > { %v2058_v0 = vld [vmem:[%s3111_s1 + $0x38] sm:$0xff]  ;;  %v2057_v1 = vld [vmem:[%s3111_s1 + $0x30] sm:$0xff]  ;;  %v2056_v2 = vld [vmem:[%s3111_s1 + $0x28] sm:$0xff] }
  0x21   : > { %2100 = vmatpush.bf16.msra.mxu1 %v2058_v0  ;;  %756 = vmatpush.bf16.msra.mxu0 %v2058_v0  ;;  %v2055_v3 = vld [vmem:[%s3111_s1 + $0x20] sm:$0xff]  ;;  %v2054_v4 = vld [vmem:[%s3111_s1 + $0x18] sm:$0xff]  ;;  %v2053_v6 = vld [vmem:[%s3111_s1 + $0x10] sm:$0xff]  ;;  %s2419_s12 = scalar_lea.vmem %s3112_s0, %s2116_s15  ;;  %s2984_s15 = sand.u32 1, %s2261_s20  }
  0x22   : > { %v2074_v5 = vld [vmem:[%s3111_s1 + $0xb8] sm:$0xff]  ;;  %v2073_v7 = vld [vmem:[%s3111_s1 + $0xb0] sm:$0xff]  ;;  %v2052_v8 = vld [vmem:[%s3111_s1 + $0x8] sm:$0xff]  ;;  %s390_s18 = scalar_lea.vmem [#allocation5], %s2984_s15  ;;  %s1848_s23 = sshll.u32 %s2984_s15, 7 }
  0x23   : > { %862 = vmatpush.bf16.msra.mxu2 %v2074_v5  ;;  %v2072_v9 = vld [vmem:[%s3111_s1 + $0xa8] sm:$0xff]  ;;  %v2051_v10 = vld [vmem:[%s3111_s1] sm:$0xff]  ;;  %v2428_v11 = vld [vmem:[%s2419_s12 + $0x50] sm:$0xff]  ;;  %s1727_s14 = scalar_lea.sflag [#allocation6], %s2984_s15 }
  0x24   : > { %v2431_v12 = vld [vmem:[%s2419_s12 + $0x58] sm:$0xff]  ;;  %v2065_v15 = vld [vmem:[%s3111_s1 + $0x70] sm:$0xff]  ;;  %v2071_v16 = vld [vmem:[%s3111_s1 + $0xa0] sm:$0xff] }
  0x25   : > { %2101 = vmatpush.bf16.msra.mxu1 %v2057_v1  ;;  %757 = vmatpush.bf16.msra.mxu0 %v2057_v1  ;;  %v2066_v13 = vld [vmem:[%s3111_s1 + $0x78] sm:$0xff]  ;;  %v548_v14 = vpack.c.bf16 %v2431_v12, %v2428_v11  ;;  %v2064_v18 = vld [vmem:[%s3111_s1 + $0x68] sm:$0xff]  ;;  %v2069_v19 = vld [vmem:[%s3111_s1 + $0x90] sm:$0xff] }
  0x26   : > { %v2070_v17 = vld [vmem:[%s3111_s1 + $0x98] sm:$0xff]  ;;  %v2063_v20 = vld [vmem:[%s3111_s1 + $0x60] sm:$0xff]  ;;  %v2460_v22 = vld [vmem:[%s2419_s12 + $0x68] sm:$0xff] }
  0x27   : > { %863 = vmatpush.bf16.msra.mxu2 %v2073_v7  ;;  %v2457_v21 = vld [vmem:[%s2419_s12 + $0x60] sm:$0xff]  ;;  %v2068_v23 = vld [vmem:[%s3111_s1 + $0x88] sm:$0xff]  ;;  %v2062_v24 = vld [vmem:[%s3111_s1 + $0x58] sm:$0xff] }
  0x28   : > { %v551_v25 = vpack.c.bf16 %v2460_v22, %v2457_v21  ;;  %v2061_v26 = vld [vmem:[%s3111_s1 + $0x50] sm:$0xff]  ;;  %v396_v27 = vld [vmem:[%s2419_s12] sm:$0xff]  ;;  %v397_v28 = vld [vmem:[%s2419_s12 + $0x8] sm:$0xff] }
  0x29   : > { %2102 = vmatpush.bf16.msra.mxu1 %v2056_v2  ;;  %758 = vmatpush.bf16.msra.mxu0 %v2056_v2  ;;  %v2476_v29 = vld [vmem:[%s2419_s12 + $0x10] sm:$0xff]  ;;  %v2067_v30 = vld [vmem:[%s3111_s1 + $0x80] sm:$0xff]  ;;  %v483_v31 = vrot.slane %v396_v27, 2  ;;  %v484_v32 = vrot.slane %v397_v28, 2  ;;  %v533_v34 = vpack.c.bf16 %v397_v28, %v396_v27  ;;  %v2060_v37 = vld [vmem:[%s3111_s1 + $0x48] sm:$0xff]  ;;  %v432_v61 = vrot.slane %v396_v27, 1 }
  0x2a   : > { %v486_v33 = vrot.slane %v2476_v29, 2  ;;  %v2059_v39 = vld [vmem:[%s3111_s1 + $0x40] sm:$0xff]  ;;  %v2497_v40 = vld [vmem:[%s2419_s12 + $0x70] sm:$0xff]  ;;  %v2500_v41 = vld [vmem:[%s2419_s12 + $0x78] sm:$0xff]  ;;  %v433_v62 = vrot.slane %v397_v28, 1  ;;  %v435_v63 = vrot.slane %v2476_v29, 1 }
  0x2b   : > { %864 = vmatpush.bf16.msra.mxu2 %v2072_v9  ;;  %v2483_v35 = vsel %vm482_vm0, %v483_v31, %v484_v32  ;;  %v554_v42 = vpack.c.bf16 %v2500_v41, %v2497_v40  ;;  %v399_v43 = vld [vmem:[%s2419_s12 + $0x18] sm:$0xff]  ;;  %v400_v44 = vld [vmem:[%s2419_s12 + $0x20] sm:$0xff]  ;;  %v401_v53 = vld [vmem:[%s2419_s12 + $0x28] sm:$0xff]  ;;  %v504_v31 = vrot.slane %v2431_v12, 2 }
  0x2c   : > { %v2486_v36 = vsel %vm482_vm0, %v484_v32, %v486_v33  ;;  %v488_v45 = vrot.slane %v399_v43, 2  ;;  %v490_v46 = vrot.slane %v400_v44, 2  ;;  %v536_v47 = vpack.c.bf16 %v399_v43, %v2476_v29  ;;  %v2516_v51 = vld [vmem:[%s2419_s12 + $0x80] sm:$0xf]  ;;  %v402_v54 = vld [vmem:[%s2419_s12 + $0x30] sm:$0xff] }
  0x2d   : > { %2103 = vmatpush.bf16.msra.mxu1 %v2055_v3  ;;  %759 = vmatpush.bf16.msra.mxu0 %v2055_v3  ;;  %v535_v38 = vpack.c.bf16 %v2486_v36, %v2483_v35  ;;  %v557_v52 = vpack.c.bf16 %v2516_v51, %v2516_v51  ;;  %v492_v55 = vrot.slane %v401_v53, 2  ;;  %v494_v56 = vrot.slane %v402_v54, 2  ;;  %v403_v3 = vld [vmem:[%s2419_s12 + $0x38] sm:$0xff] }
  0x2e   : > { %v2508_v48 = vsel %vm482_vm0, %v486_v33, %v488_v45  ;;  %v2511_v49 = vsel %vm482_vm0, %v488_v45, %v490_v46  ;;  %v539_v57 = vpack.c.bf16 %v401_v53, %v400_v44  ;;  %v434_v0 = vsel %vm431_vm1, %v432_v61, %v433_v62 }
  0x2f   : > { %865 = vmatpush.bf16.msra.mxu2 %v2071_v16  ;;  %v538_v50 = vpack.c.bf16 %v2511_v49, %v2508_v48  ;;  %v2523_v58 = vsel %vm482_vm0, %v490_v46, %v492_v55  ;;  %v2526_v59 = vsel %vm482_vm0, %v492_v55, %v494_v56  ;;  %v436_v1 = vsel %vm431_vm1, %v433_v62, %v435_v63 }
  0x30   : > { %v541_v60 = vpack.c.bf16 %v2526_v59, %v2523_v58  ;;  %v534_v2 = vpack.c.bf16 %v436_v1, %v434_v0  ;;  %v496_v5 = vrot.slane %v403_v3, 2  ;;  %v542_v7 = vpack.c.bf16 %v403_v3, %v402_v54 }
  0x31   : > { %2104 = vmatpush.bf16.msra.mxu1 %v2054_v4  ;;  %760 = vmatpush.bf16.msra.mxu0 %v2054_v4  ;;  %v404_v4 = vld [vmem:[%s2419_s12 + $0x40] sm:$0xff]  ;;  %v441_v27 = vrot.slane %v401_v53, 1  ;;  %v443_v28 = vrot.slane %v402_v54, 1  ;;  %v506_v32 = vrot.slane %v2457_v21, 2  ;;  %v459_v61 = vrot.slane %v2497_v40, 1 }
  0x32   : > { %v512_v0 = vrot.slane %v2500_v41, 2  ;;  %v514_v1 = vrot.slane %v2516_v51, 2 }
  0x33   : > { %866 = vmatpush.bf16.msra.mxu2 %v2070_v17 }
  0x35   : > { %2105 = vmatpush.bf16.msra.mxu1 %v2053_v6  ;;  %761 = vmatpush.bf16.msra.mxu0 %v2053_v6  ;;  %v498_v6 = vrot.slane %v404_v4, 2 }
  0x37   : > { %867 = vmatpush.bf16.msra.mxu2 %v2069_v19  ;;  %v2539_v9 = vsel %vm482_vm0, %v496_v5, %v498_v6  ;;  %v405_v19 = vld [vmem:[%s2419_s12 + $0x48] sm:$0xff]  ;;  %s1752_s12 = scalar_lea.hbm %s3101_s11, %s2360_s9 }
  0x38   : > { %s1756_s13 = sshll.u32 %s1752_s12, 4  ;;  %s1757_s13 = int_to_ptr.hbm [resolvable:$true] %s1756_s13 }
  0x39   : > { %2106 = vmatpush.bf16.msra.mxu1 %v2052_v8  ;;  %762 = vmatpush.bf16.msra.mxu0 %v2052_v8  ;;  %v2536_v8 = vsel %vm482_vm0, %v494_v56, %v496_v5  ;;  %s2189_s16 = sshra.s32 %s1757_s13, 4  ;;  %s2190_s16 = int_to_ptr.hbm [resolvable:$true] %s2189_s16 }
  0x3a   : > { %s2191_s17 = scalar_lea.hbm %s2190_s16, 1  ;;  %p2196_p0 = scmp.lt.s32.totalorder %s2190_s16, %s3101_s11 }
  0x3b   : > { %868 = vmatpush.bf16.msra.mxu2 %v2068_v23  ;;  %v545_v23 = vpack.c.bf16 %v405_v19, %v404_v4  ;;  %p2192_p11 = scmp.ne.s32.totalorder %s2190_s16, %s2191_s17 }
  0x3d   : > { %2107 = vmatpush.bf16.msra.mxu1 %v2051_v10  ;;  %763 = vmatpush.bf16.msra.mxu0 %v2051_v10  ;;  %v544_v10 = vpack.c.bf16 %v2539_v9, %v2536_v8  ;;  %p2193_p12 = pnand %p2192_p11, %p2377_p5 }
  0x3f   : > { %869 = vmatpush.bf16.msra.mxu2 %v2067_v30  ;;  %v444_v30 = vsel %vm431_vm1, %v441_v27, %v443_v28  ;;  %p2194_p13 = pneg %p2193_p12 }
  0x40   : > { %789 = vmatmul.bf16.vlgmr.msra.gmra.mxu1 %v548_v14  ;;  %764 = vmatmul.bf16.vlgmr.msra.gmra.mxu0 %v533_v34  ;;  %v439_v14 = vrot.slane %v400_v44, 1  ;;  %v455_v44 = vrot.slane %v2457_v21, 1 }
  0x41   : > { %809 = vmatpush.bf16.msrb.mxu1 %v2066_v13  ;;  %v437_v13 = vrot.slane %v399_v43, 1  ;;  %v453_v43 = vrot.slane %v2431_v12, 1 }
  0x42   : > { %870 = vmatmul.bf16.vlgmr.msra.gmra.mxu2 %v535_v38  ;;  %v442_v29 = vsel %vm431_vm1, %v439_v14, %v441_v27 }
  0x43   : > { %v440_v16 = vsel %vm431_vm1, %v437_v13, %v439_v14  ;;  %v540_v33 = vpack.c.bf16 %v444_v30, %v442_v29  ;;  %v456_v55 = vsel %vm431_vm1, %v453_v43, %v455_v44  ;;  %v2606_v14 = vrot.slane %v2516_v51, 1  ;;  %v2097_v30 = vld [vmem:[%s3093_s3 + $0xb0] sm:$0xff] }
  0x45   : > { %810 = vmatpush.bf16.msrb.mxu1 %v2065_v15  ;;  %v438_v15 = vsel %vm431_vm1, %v435_v63, %v437_v13  ;;  %v461_v13 = vrot.slane %v2500_v41, 1  ;;  %v2081_v41 = vld [vmem:[%s3093_s3 + $0x30] sm:$0xff] }
  0x46   : > { %v537_v17 = vpack.c.bf16 %v440_v16, %v438_v15 }
  0x47   : > { %v462_v16 = vsel %vm431_vm1, %v459_v61, %v461_v13 }
  0x49   : > { %811 = vmatpush.bf16.msrb.mxu1 %v2064_v18  ;;  %v502_v18 = vrot.slane %v2428_v11, 2 }
  0x4b   : > { %v2560_v34 = vsel %vm482_vm0, %v502_v18, %v504_v31 }
  0x4d   : > { %812 = vmatpush.bf16.msrb.mxu1 %v2063_v20  ;;  %v500_v20 = vrot.slane %v405_v19, 2 }
  0x50   : > { %794 = vmatmul.bf16.gmra.mxu1 %v551_v25  ;;  %769 = vmatmul.bf16.gmra.mxu0 %v536_v47  ;;  %v2551_v25 = vsel %vm482_vm0, %v500_v20, %v502_v18  ;;  %v451_v47 = vrot.slane %v2428_v11, 1 }
  0x51   : > { %813 = vmatpush.bf16.msrb.mxu1 %v2062_v24  ;;  %v2548_v24 = vsel %vm482_vm0, %v498_v6, %v500_v20  ;;  %v2080_v20 = vld [vmem:[%s3093_s3 + $0x28] sm:$0xff] }
  0x52   : > { %875 = vmatmul.bf16.gmra.mxu2 %v538_v50  ;;  %v508_v50 = vrot.slane %v2460_v22, 2  ;;  %v454_v54 = vsel %vm431_vm1, %v451_v47, %v453_v43  ;;  %v2076_v43 = vld [vmem:[%s3093_s3 + $0x8] sm:$0xff] }
  0x53   : > { %v549_v56 = vpack.c.bf16 %v456_v55, %v454_v54  ;;  %v2092_v55 = vld [vmem:[%s3093_s3 + $0x88] sm:$0xff] }
  0x54   : > { %v2577_v12 = vsel %vm482_vm0, %v506_v32, %v508_v50 }
  0x55   : > { %814 = vmatpush.bf16.msrb.mxu1 %v2061_v26  ;;  %v547_v26 = vpack.c.bf16 %v2551_v25, %v2548_v24  ;;  %3113 = vst [vmem:[#allocation9_spill] sm:$0xff] %v2577_v12 }
  0x59   : > { %815 = vmatpush.bf16.msrb.mxu1 %v2060_v37  ;;  %v2563_v37 = vsel %vm482_vm0, %v504_v31, %v506_v32  ;;  %v2078_v31 = vld [vmem:[%s3093_s3 + $0x18] sm:$0xff] }
  0x5a   : > { %v550_v38 = vpack.c.bf16 %v2563_v37, %v2560_v34 }
  0x5d   : > { %816 = vmatpush.bf16.msrb.mxu1 %v2059_v39  ;;  %v445_v39 = vrot.slane %v403_v3, 1 }
  0x5f   : > { %v446_v45 = vsel %vm431_vm1, %v443_v28, %v445_v39  ;;  %v2079_v28 = vld [vmem:[%s3093_s3 + $0x20] sm:$0xff] }
  0x60   : > { %799 = vmatmul.bf16.gmra.mxu1 %v554_v42  ;;  %774 = vmatmul.bf16.gmra.mxu0 %v539_v57  ;;  %v447_v42 = vrot.slane %v404_v4, 1  ;;  %v449_v57 = vrot.slane %v405_v19, 1  ;;  %v2082_v19 = vld [vmem:[%s3093_s3 + $0x38] sm:$0xff] }
  0x61   : > { %1422 = vmatpush.bf16.msrb.mxu2 %v2082_v19  ;;  %2108 = vmatpush.bf16.msra.mxu3 %v2082_v19 }
  0x62   : > { %880 = vmatmul.bf16.gmra.mxu2 %v541_v60  ;;  %v448_v46 = vsel %vm431_vm1, %v445_v39, %v447_v42  ;;  %v457_v60 = vrot.slane %v2460_v22, 1  ;;  %v450_v62 = vsel %vm431_vm1, %v447_v42, %v449_v57  ;;  %v452_v63 = vsel %vm431_vm1, %v449_v57, %v451_v47  ;;  %v2095_v42 = vld [vmem:[%s3093_s3 + $0xa0] sm:$0xff] }
  0x63   : > { %v543_v53 = vpack.c.bf16 %v448_v46, %v446_v45  ;;  %v2094_v46 = vld [vmem:[%s3093_s3 + $0x98] sm:$0xff]  ;;  %v2075_v47 = vld [vmem:[%s3093_s3] sm:$0xff] }
  0x64   : > { %v458_v4 = vsel %vm431_vm1, %v455_v44, %v457_v60  ;;  %v460_v5 = vsel %vm431_vm1, %v457_v60, %v459_v61  ;;  %v2676_v60 = vld [vmem:[%s3117_s2] ss:$0 sm:$0xff]  ;;  %s2195_s2 = scalar_lea.hbm %s3101_s11, 2 }
  0x65   : > { %v552_v6 = vpack.c.bf16 %v460_v5, %v458_v4  ;;  %1423 = vmatpush.bf16.msrb.mxu2 %v2081_v41  ;;  %2109 = vmatpush.bf16.msra.mxu3 %v2081_v41  ;;  %p2197_p1 = scmp.lt.s32.totalorder %s2195_s2, %s2191_s17 }
  0x67   : > { %p2198_p2 = por %p2197_p1, %p2196_p0 }
  0x69   : > { %1424 = vmatpush.bf16.msrb.mxu2 %v2080_v20  ;;  %2110 = vmatpush.bf16.msra.mxu3 %v2080_v20  ;;  %p2199_p3 = pnand %p2198_p2, %p2194_p13 }
  0x6d   : > { %1425 = vmatpush.bf16.msrb.mxu2 %v2079_v28  ;;  %2111 = vmatpush.bf16.msra.mxu3 %v2079_v28 }
  0x70   : > { %804 = vmatmul.bf16.gmra.mxu1 %v557_v52  ;;  %779 = vmatmul.bf16.gmra.mxu0 %v542_v7  ;;  %v510_v52 = vrot.slane %v2497_v40, 2  ;;  %v2598_v40 = vsel %vm482_vm0, %v512_v0, %v514_v1 }
  0x71   : > { %3116 = vst [vmem:[#allocation12_spill] sm:$0xff] %v2598_v40  ;;  %1426 = vmatpush.bf16.msrb.mxu2 %v2078_v31  ;;  %2112 = vmatpush.bf16.msra.mxu3 %v2078_v31 }
  0x72   : > { %885 = vmatmul.bf16.gmra.mxu2 %v544_v10  ;;  %v2580_v21 = vsel %vm482_vm0, %v508_v50, %v510_v52  ;;  %v2595_v22 = vsel %vm482_vm0, %v510_v52, %v512_v0  ;;  %v2093_v52 = vld [vmem:[%s3093_s3 + $0x90] sm:$0xff] }
  0x73   : > { %3114 = vst [vmem:[#allocation10_spill] sm:$0xff] %v2580_v21  ;;  %v553_v11 = vpack.c.bf16 %v2580_v21, %v2577_v12  ;;  %v556_v7 = vpack.c.bf16 %v2598_v40, %v2595_v22 }
  0x74   : > { %3115 = vst [vmem:[#allocation11_spill] sm:$0xff] %v2595_v22 }
  0x80   : > { %817 = vmatmul.bf16.vlgmr.msrb.gmra.mxu1 %v534_v2  ;;  %784 = vmatmul.bf16.gmra.mxu0 %v545_v23  ;;  %v546_v2 = vpack.c.bf16 %v452_v63, %v450_v62  ;;  %v2098_v23 = vld [vmem:[%s3093_s3 + $0xb8] sm:$0xff]  ;;  %v558_v63 = vpack.c.bf16 %v2606_v14, %v2606_v14 }
  0x81   : > { %1520 = vmatpush.bf16.msrb.mxu0 %v2098_v23 }
  0x82   : > { %890 = vmatmul.bf16.gmra.mxu2 %v547_v26  ;;  %v559_v26 = vpack.c.bf16 %v514_v1, %v514_v1 }
  0x85   : > { %1521 = vmatpush.bf16.msrb.mxu0 %v2097_v30 }
  0x90   : > { %822 = vmatmul.bf16.gmra.mxu1 %v537_v17  ;;  %v464_v17 = vsel %vm431_vm1, %v461_v13, %v2606_v14 }
  0x91   : > { %v555_v18 = vpack.c.bf16 %v464_v17, %v462_v16 }
  0x92   : > { %895 = vmatmul.bf16.gmra.mxu2 %v550_v38  ;;  %v2077_v38 = vld [vmem:[%s3093_s3 + $0x10] sm:$0xff] }
  0x93   : > { %1427 = vmatpush.bf16.msrb.mxu2 %v2077_v38  ;;  %2113 = vmatpush.bf16.msra.mxu3 %v2077_v38 }
  0x97   : > { %1428 = vmatpush.bf16.msrb.mxu2 %v2076_v43  ;;  %2114 = vmatpush.bf16.msra.mxu3 %v2076_v43 }
  0x9b   : > { %1429 = vmatpush.bf16.msrb.mxu2 %v2075_v47  ;;  %2115 = vmatpush.bf16.msra.mxu3 %v2075_v47 }
  0xa0   : > { %827 = vmatmul.bf16.gmra.mxu1 %v540_v33  ;;  %v2096_v33 = vld [vmem:[%s3093_s3 + $0xa8] sm:$0xff] }
  0xa1   : > { %1522 = vmatpush.bf16.msrb.mxu0 %v2096_v33 }
  0xa2   : > { %900 = vmatmul.bf16.gmra.mxu2 %v553_v11  ;;  %v2091_v11 = vld [vmem:[%s3093_s3 + $0x80] sm:$0xff] }
  0xa5   : > { %1523 = vmatpush.bf16.msrb.mxu0 %v2095_v42 }
  0xa9   : > { %1524 = vmatpush.bf16.msrb.mxu0 %v2094_v46 }
  0xad   : > { %1525 = vmatpush.bf16.msrb.mxu0 %v2093_v52 }
  0xb0   : > { %832 = vmatmul.bf16.gmra.mxu1 %v543_v53 }
  0xb1   : > { %1526 = vmatpush.bf16.msrb.mxu0 %v2092_v55 }
  0xb2   : > { %905 = vmatmul.bf16.gmra.mxu2 %v556_v7 }
  0xb5   : > { %1527 = vmatpush.bf16.msrb.mxu0 %v2091_v11 }
  0xbd   : > { %v2590_v3 = vpop.f32.mrf.mxu1  ;;  %v765_v44 = vpop.f32.mrf.mxu0 }
  0xbe   : > { %v766_v61 = vadd.f32 %v2676_v60, %v765_v44 }
  0xc0   : > { %837 = vmatmul.bf16.gmra.mxu1 %v546_v2  ;;  %v967_v2 = vlaneseq }
  0xc2   : > { %910 = vmatmul.bf16.gmra.mxu2 %v559_v26  ;;  %v2686_v13 = vshrl.u32 %v967_v2, 7 }
  0xc4   : > { %vm985_vm3 = vcmp.ge.s32.totalorder %v2686_v13, 1 }
  0xc5   : > { %v2602_v10 = vpop.f32.mrf.mxu1  ;;  %v871_v27 = vpop.f32.mrf.mxu2  ;;  %vm2042_vm6 = vmpackc.low %vm2271_vm5, %vm985_vm3 }
  0xc6   : > { %v767_v54 = vpop.f32.mrf.mxu0 }
  0xc7   : > { %v768_v16 = vadd.f32 %v2676_v60, %v767_v54 }
  0xcd   : > { %v2608_v15 = vpop.f32.mrf.mxu1  ;;  %v873_v32 = vpop.f32.mrf.mxu2 }
  0xce   : > { %v770_v62 = vpop.f32.mrf.mxu0 }
  0xcf   : > { %v771_v23 = vadd.f32 %v2676_v60, %v770_v62 }
  0xd0   : > { %842 = vmatmul.bf16.gmra.mxu1 %v549_v56 }
  0xd5   : > { %v2619_v51 = vpop.f32.mrf.mxu1  ;;  %v876_v45 = vpop.f32.mrf.mxu2 }
  0xdd   : > { %v2630_v29 = vpop.f32.mrf.mxu1  ;;  %v2663_v53 = vpop.f32.mrf.mxu2 }
  0xe0   : > { %847 = vmatmul.bf16.gmra.mxu1 %v552_v6  ;;  %v2683_v6 = vstv %s413_s26  ;;  %s1754_s26 = sshll.u32 %s390_s18, 4  ;;  %s1755_s26 = int_to_ptr.vmem [resolvable:$true] %s1754_s26 }
  0xe5   : > { %v2644_v39 = vpop.f32.mrf.mxu1  ;;  %v2671_v57 = vpop.f32.mrf.mxu2 }
  0xed   : > { %v2658_v50 = vpop.f32.mrf.mxu1  ;;  %v2681_v4 = vpop.f32.mrf.mxu2 }
  0xf0   : > { %852 = vmatmul.bf16.gmra.mxu1 %v555_v18  ;;  %v772_v18 = vpop.f32.mrf.mxu0 }
  0xf1   : > { %v773_v54 = vadd.f32 %v2676_v60, %v772_v18 }
  0xf5   : > { %v807_v56 = vpop.f32.mrf.mxu1  ;;  %v2690_v41 = vpop.f32.mrf.mxu2 }
  0xf8   : > { %v775_v43 = vpop.f32.mrf.mxu0 }
  0xf9   : > { %v776_v18 = vadd.f32 %v2676_v60, %v775_v43 }
  0xfd   : > { %v818_v0 = vpop.f32.mrf.mxu1  ;;  %v2694_v44 = vpop.f32.mrf.mxu2 }
  0xfe   : > { %v819_v1 = vadd.f32 %v818_v0, %v766_v61 }
 0x100   : > { %v872_v5 = vadd.f32 %v871_v27, %v819_v1  ;;  %857 = vmatmul.bf16.gmra.mxu1 %v558_v63 }
 0x102   : > { %v933_v7 = vmul.f32 %v2683_v6, %v872_v5  ;;  %vm915_vm2 = vcmp.ge.f32.partialorder %v872_v5, 0.0 }
 0x104   : > { %v950_v14 = vsel %vm915_vm2, %v872_v5, %v933_v7 }
 0x105   : > { %v820_v17 = vpop.f32.mrf.mxu1  ;;  %v1070_v27 = vsel %vm985_vm3, %v950_v14, 0.0  ;;  %v2703_v2 = vpop.f32.mrf.mxu2 }
 0x106   : > { %v821_v19 = vadd.f32 %v820_v17, %v768_v16  ;;  %v1104_v33 = vrot.slane %v1070_v27, 1  ;;  %v1153_v61 = vrot.slane %v1070_v27, 2  ;;  %v777_v17 = vpop.f32.mrf.mxu0 }
 0x108   : > { %v874_v20 = vadd.f32 %v873_v32, %v821_v19 }
 0x10a   : > { %vm916_vm4 = vcmp.ge.f32.partialorder %v874_v20, 0.0  ;;  %v934_v26 = vmul.f32 %v2683_v6, %v874_v20 }
 0x10c   : > { %v951_v28 = vsel %vm916_vm4, %v874_v20, %v934_v26 }
 0x10d   : > { %v1105_v30 = vrot.slane %v951_v28, 1  ;;  %v823_v31 = vpop.f32.mrf.mxu1  ;;  %v2043_v38 = vpack.c.bf16 %v951_v28, %v950_v14  ;;  %v1154_v52 = vrot.slane %v951_v28, 2  ;;  %v2713_v28 = vpop.f32.mrf.mxu2 }
 0x10e   : > { %v824_v42 = vadd.f32 %v823_v31, %v771_v23 }
 0x10f   : > { %2044 = vmatmul.msk.bf16.vlgmr.msrb.gmra.mxu2 %vm2042_vm6, %v2043_v38  ;;  %v2697_v32 = vsel %vm431_vm1, %v1104_v33, %v1105_v30  ;;  %v1155_v0 = vsel %vm482_vm0, %v1153_v61, %v1154_v52  ;;  %v780_v38 = vpop.f32.mrf.mxu0 }
 0x110   : > { %v877_v46 = vadd.f32 %v876_v45, %v824_v42  ;;  %v778_v42 = vadd.f32 %v2676_v60, %v777_v17 }
 0x112   : > { %vm917_vm7 = vcmp.ge.f32.partialorder %v877_v46, 0.0  ;;  %v935_v47 = vmul.f32 %v2683_v6, %v877_v46 }
 0x114   : > { %v952_v55 = vsel %vm917_vm7, %v877_v46, %v935_v47  ;;  %v2090_v46 = vld [vmem:[%s3093_s3 + $0x78] sm:$0xff] }
 0x115   : > { %v1107_v56 = vrot.slane %v952_v55, 1  ;;  %v1156_v11 = vrot.slane %v952_v55, 2  ;;  %v825_v62 = vpop.f32.mrf.mxu1  ;;  %1471 = vmatpush.bf16.msrb.mxu3 %v2090_v46  ;;  %v2726_v61 = vpop.f32.mrf.mxu2 }
 0x116   : > { %v826_v63 = vadd.f32 %v825_v62, %v773_v54 }
 0x117   : > { %v1157_v1 = vsel %vm482_vm0, %v1154_v52, %v1156_v11  ;;  %v2706_v45 = vsel %vm431_vm1, %v1105_v30, %v1107_v56 }
 0x118   : > { %v879_v5 = vadd.f32 %v2663_v53, %v826_v63  ;;  %v1204_v7 = vpack.c.bf16 %v1157_v1, %v1155_v0  ;;  %v1203_v16 = vpack.c.bf16 %v2706_v45, %v2697_v32 }
 0x11a   : > { %v936_v19 = vmul.f32 %v2683_v6, %v879_v5  ;;  %1528 = vmatmul.bf16.vlgmr.msrb.gmra.mxu0 %v1204_v7  ;;  %vm918_vm8 = vcmp.ge.f32.partialorder %v879_v5, 0.0 }
 0x11c   : > { %v953_v14 = vsel %vm918_vm8, %v879_v5, %v936_v19  ;;  %v781_v5 = vadd.f32 %v2676_v60, %v780_v38 }
 0x11d   : > { %v828_v20 = vpop.f32.mrf.mxu1  ;;  %v1109_v23 = vrot.slane %v953_v14, 1  ;;  %v1205_v26 = vpack.c.bf16 %v953_v14, %v952_v55  ;;  %v1158_v33 = vrot.slane %v953_v14, 2 }
 0x11e   : > { %v829_v27 = vadd.f32 %v828_v20, %v776_v18  ;;  %v782_v18 = vpop.f32.mrf.mxu0 }
 0x11f   : > { %1435 = vmatmul.bf16.gmra.mxu2 %v1205_v26  ;;  %v2716_v53 = vsel %vm431_vm1, %v1107_v56, %v1109_v23  ;;  %v1159_v56 = vsel %vm482_vm0, %v1156_v11, %v1158_v33  ;;  %v2089_v11 = vld [vmem:[%s3093_s3 + $0x70] sm:$0xff] }
 0x120   : > { %v882_v30 = vadd.f32 %v2671_v57, %v829_v27  ;;  %1472 = vmatpush.bf16.msrb.mxu3 %v2089_v11 }
 0x122   : > { %vm919_vm9 = vcmp.ge.f32.partialorder %v882_v30, 0.0  ;;  %v937_v31 = vmul.f32 %v2683_v6, %v882_v30 }
 0x124   : > { %v954_v43 = vsel %vm919_vm9, %v882_v30, %v937_v31 }
 0x125   : > { %v830_v47 = vpop.f32.mrf.mxu1  ;;  %v1160_v52 = vrot.slane %v954_v43, 2  ;;  %v1111_v54 = vrot.slane %v954_v43, 1 }
 0x126   : > { %v831_v55 = vadd.f32 %v830_v47, %v778_v42  ;;  %v2088_v42 = vld [vmem:[%s3093_s3 + $0x68] sm:$0xff] }
 0x127   : > { %v1161_v57 = vsel %vm482_vm0, %v1158_v33, %v1160_v52  ;;  %v2729_v62 = vsel %vm431_vm1, %v1109_v23, %v1111_v54  ;;  %v2739_v23 = vpop.f32.mrf.mxu2  ;;  %v783_v33 = vadd.f32 %v2676_v60, %v782_v18  ;;  %1473 = vmatpush.bf16.msrb.mxu3 %v2088_v42 }
 0x128   : > { %v884_v63 = vadd.f32 %v2681_v4, %v831_v55  ;;  %v1207_v0 = vpack.c.bf16 %v1161_v57, %v1159_v56  ;;  %v1206_v1 = vpack.c.bf16 %v2729_v62, %v2716_v53 }
 0x12a   : > { %v938_v7 = vmul.f32 %v2683_v6, %v884_v63  ;;  %1533 = vmatmul.bf16.gmra.mxu0 %v1207_v0  ;;  %vm920_vm10 = vcmp.ge.f32.partialorder %v884_v63, 0.0 }
 0x12c   : > { %v955_v17 = vsel %vm920_vm10, %v884_v63, %v938_v7 }
 0x12d   : > { %v833_v19 = vpop.f32.mrf.mxu1  ;;  %v1113_v14 = vrot.slane %v955_v17, 1  ;;  %v1208_v4 = vpack.c.bf16 %v955_v17, %v954_v43  ;;  %v1162_v31 = vrot.slane %v955_v17, 2 }
 0x12e   : > { %v834_v20 = vadd.f32 %v833_v19, %v781_v5 }
 0x12f   : > { %1440 = vmatmul.bf16.gmra.mxu2 %v1208_v4  ;;  %v2742_v26 = vsel %vm431_vm1, %v1111_v54, %v1113_v14  ;;  %v785_v54 = vpop.f32.mrf.mxu0  ;;  %v1163_v56 = vsel %vm482_vm0, %v1160_v52, %v1162_v31  ;;  %v2756_v5 = vpop.f32.mrf.mxu2 }
 0x130   : > { %v887_v27 = vadd.f32 %v2690_v41, %v834_v20  ;;  %v786_v11 = vadd.f32 %v2676_v60, %v785_v54 }
 0x132   : > { %vm921_vm11 = vcmp.ge.f32.partialorder %v887_v27, 0.0  ;;  %v939_v30 = vmul.f32 %v2683_v6, %v887_v27 }
 0x134   : > { %v956_v38 = vsel %vm921_vm11, %v887_v27, %v939_v30 }
 0x135   : > { %v835_v43 = vpop.f32.mrf.mxu1  ;;  %v1164_v46 = vrot.slane %v956_v38, 2  ;;  %v1115_v47 = vrot.slane %v956_v38, 1 }
 0x136   : > { %v836_v55 = vadd.f32 %v835_v43, %v783_v33 }
 0x137   : > { %v1165_v41 = vsel %vm482_vm0, %v1162_v31, %v1164_v46  ;;  %v2753_v57 = vsel %vm431_vm1, %v1113_v14, %v1115_v47  ;;  %v787_v27 = vpop.f32.mrf.mxu0  ;;  %v2767_v31 = vpop.f32.mrf.mxu2 }
 0x138   : > { %v889_v63 = vadd.f32 %v2694_v44, %v836_v55  ;;  %v1210_v0 = vpack.c.bf16 %v1165_v41, %v1163_v56  ;;  %v1209_v7 = vpack.c.bf16 %v2753_v57, %v2742_v26  ;;  %v788_v42 = vadd.f32 %v2676_v60, %v787_v27 }
 0x13a   : > { %v940_v17 = vmul.f32 %v2683_v6, %v889_v63  ;;  %1538 = vmatmul.bf16.gmra.mxu0 %v1210_v0  ;;  %vm922_vm12 = vcmp.ge.f32.partialorder %v889_v63, 0.0 }
 0x13c   : > { %v957_v52 = vsel %vm922_vm12, %v889_v63, %v940_v17 }
 0x13d   : > { %v838_v18 = vpop.f32.mrf.mxu1  ;;  %v1117_v19 = vrot.slane %v957_v52, 1  ;;  %v1211_v4 = vpack.c.bf16 %v957_v52, %v956_v38  ;;  %v1166_v33 = vrot.slane %v957_v52, 2  ;;  %v2087_v38 = vld [vmem:[%s3093_s3 + $0x60] sm:$0xff] }
 0x13e   : > { %v839_v14 = vadd.f32 %v838_v18, %v786_v11  ;;  %1474 = vmatpush.bf16.msrb.mxu3 %v2087_v38  ;;  %v2086_v18 = vld [vmem:[%s3093_s3 + $0x58] sm:$0xff] }
 0x13f   : > { %1445 = vmatmul.bf16.vlgmr.msra.gmra.mxu3 %v1211_v4  ;;  %v2763_v44 = vsel %vm431_vm1, %v1115_v47, %v1117_v19 }
 0x140   : > { %v892_v20 = vadd.f32 %v2703_v2, %v839_v14  ;;  %v1167_v2 = vsel %vm482_vm0, %v1164_v46, %v1166_v33  ;;  %v791_v46 = vadd.f32 %v2676_v60, %v2590_v3  ;;  %v793_v3 = vadd.f32 %v2676_v60, %v2602_v10 }
 0x142   : > { %vm923_vm13 = vcmp.ge.f32.partialorder %v892_v20, 0.0  ;;  %v941_v30 = vmul.f32 %v2683_v6, %v892_v20  ;;  %1475 = vmatpush.bf16.msrb.mxu3 %v2086_v18 }
 0x144   : > { %v958_v43 = vsel %vm923_vm13, %v892_v20, %v941_v30 }
 0x145   : > { %v840_v55 = vpop.f32.mrf.mxu1  ;;  %v1168_v54 = vrot.slane %v958_v43, 2  ;;  %v1119_v47 = vrot.slane %v958_v43, 1 }
 0x146   : > { %v841_v56 = vadd.f32 %v840_v55, %v788_v42 }
 0x147   : > { %v1169_v41 = vsel %vm482_vm0, %v1166_v33, %v1168_v54  ;;  %v2776_v63 = vsel %vm431_vm1, %v1117_v19, %v1119_v47  ;;  %v2787_v19 = vpop.f32.mrf.mxu2 }
 0x148   : > { %v894_v0 = vadd.f32 %v2713_v28, %v841_v56  ;;  %v1213_v11 = vpack.c.bf16 %v1169_v41, %v1167_v2  ;;  %v1212_v17 = vpack.c.bf16 %v2776_v63, %v2763_v44  ;;  %v2085_v56 = vld [vmem:[%s3093_s3 + $0x50] sm:$0xff] }
 0x149   : > { %1476 = vmatpush.bf16.msrb.mxu3 %v2085_v56 }
 0x14a   : > { %v942_v52 = vmul.f32 %v2683_v6, %v894_v0  ;;  %1543 = vmatmul.bf16.gmra.mxu0 %v1213_v11  ;;  %vm924_vm14 = vcmp.ge.f32.partialorder %v894_v0, 0.0 }
 0x14c   : > { %v959_v4 = vsel %vm924_vm14, %v894_v0, %v942_v52 }
 0x14d   : > { %v843_v28 = vpop.f32.mrf.mxu1  ;;  %v1121_v14 = vrot.slane %v959_v4, 1  ;;  %v1214_v20 = vpack.c.bf16 %v959_v4, %v958_v43  ;;  %v1170_v38 = vrot.slane %v959_v4, 2 }
 0x14e   : > { %v844_v27 = vadd.f32 %v843_v28, %v791_v46  ;;  %v2084_v28 = vld [vmem:[%s3093_s3 + $0x48] sm:$0xff] }
 0x14f   : > { %1450 = vmatmul.bf16.gmra.mxu3 %v1214_v20  ;;  %v2790_v30 = vsel %vm431_vm1, %v1119_v47, %v1121_v14  ;;  %v2799_v47 = vpop.f32.mrf.mxu2 }
 0x150   : > { %v897_v33 = vadd.f32 %v2726_v61, %v844_v27  ;;  %v1171_v61 = vsel %vm482_vm0, %v1168_v54, %v1170_v38  ;;  %v796_v54 = vadd.f32 %v2676_v60, %v2608_v15  ;;  %1477 = vmatpush.bf16.msrb.mxu3 %v2084_v28 }
 0x152   : > { %vm925_vm15 = vcmp.ge.f32.partialorder %v897_v33, 0.0  ;;  %v943_v42 = vmul.f32 %v2683_v6, %v897_v33 }
 0x154   : > { %v960_v55 = vsel %vm925_vm15, %v897_v33, %v943_v42 }
 0x155   : > { %v845_v43 = vpop.f32.mrf.mxu1  ;;  %v1172_v2 = vrot.slane %v960_v55, 2  ;;  %v1123_v41 = vrot.slane %v960_v55, 1 }
 0x156   : > { %v846_v0 = vadd.f32 %v845_v43, %v793_v3 }
 0x157   : > { %v1173_v11 = vsel %vm482_vm0, %v1170_v38, %v1172_v2  ;;  %v2804_v52 = vsel %vm431_vm1, %v1121_v14, %v1123_v41  ;;  %v2815_v38 = vpop.f32.mrf.mxu2 }
 0x158   : > { %v899_v10 = vadd.f32 %v2739_v23, %v846_v0  ;;  %v1216_v18 = vpack.c.bf16 %v1173_v11, %v1171_v61  ;;  %v1215_v46 = vpack.c.bf16 %v2804_v52, %v2790_v30  ;;  %v798_v0 = vadd.f32 %v2676_v60, %v2619_v51 }
 0x15a   : > { %v944_v4 = vmul.f32 %v2683_v6, %v899_v10  ;;  %1548 = vmatmul.bf16.gmra.mxu0 %v1216_v18  ;;  %vm926_vm2 = vcmp.ge.f32.partialorder %v899_v10, 0.0 }
 0x15c   : > { %v961_v20 = vsel %vm926_vm2, %v899_v10, %v944_v4 }
 0x15d   : > { %v848_v14 = vpop.f32.mrf.mxu1  ;;  %v1125_v27 = vrot.slane %v961_v20, 1  ;;  %v1174_v23 = vrot.slane %v961_v20, 2  ;;  %v1217_v33 = vpack.c.bf16 %v961_v20, %v960_v55 }
 0x15e   : > { %v849_v42 = vadd.f32 %v848_v14, %v796_v54  ;;  %v801_v14 = vadd.f32 %v2676_v60, %v2630_v29 }
 0x15f   : > { %1455 = vmatmul.bf16.gmra.mxu3 %v1217_v33  ;;  %v1175_v3 = vsel %vm482_vm0, %v1172_v2, %v1174_v23  ;;  %v2819_v56 = vsel %vm431_vm1, %v1123_v41, %v1125_v27  ;;  %v2083_v2 = vld [vmem:[%s3093_s3 + $0x40] sm:$0xff]  ;;  %v913_v4 = vpop.f32.mrf.mxu2 }
 0x160   : > { %v902_v43 = vadd.f32 %v2756_v5, %v849_v42  ;;  %1478 = vmatpush.bf16.msrb.mxu3 %v2083_v2 }
 0x162   : > { %vm927_vm3 = vcmp.ge.f32.partialorder %v902_v43, 0.0  ;;  %v945_v15 = vmul.f32 %v2683_v6, %v902_v43 }
 0x164   : > { %v962_v61 = vsel %vm927_vm3, %v902_v43, %v945_v15 }
 0x165   : > { %v850_v11 = vpop.f32.mrf.mxu1  ;;  %v1176_v55 = vrot.slane %v962_v61, 2  ;;  %v1127_v10 = vrot.slane %v962_v61, 1 }
 0x166   : > { %v851_v18 = vadd.f32 %v850_v11, %v798_v0 }
 0x167   : > { %v1177_v41 = vsel %vm482_vm0, %v1174_v23, %v1176_v55  ;;  %v2830_v5 = vsel %vm431_vm1, %v1125_v27, %v1127_v10 }
 0x168   : > { %v904_v28 = vadd.f32 %v2767_v31, %v851_v18  ;;  %v1219_v54 = vpack.c.bf16 %v1177_v41, %v1175_v3  ;;  %v1218_v51 = vpack.c.bf16 %v2830_v5, %v2819_v56  ;;  %v803_v18 = vadd.f32 %v2676_v60, %v2644_v39 }
 0x169   : > { %v806_v39 = vadd.f32 %v2676_v60, %v2658_v50 }
 0x16a   : > { %v946_v20 = vmul.f32 %v2683_v6, %v904_v28  ;;  %1553 = vmatmul.bf16.gmra.mxu0 %v1219_v54  ;;  %vm928_vm4 = vcmp.ge.f32.partialorder %v904_v28, 0.0 }
 0x16c   : > { %v963_v33 = vsel %vm928_vm4, %v904_v28, %v946_v20 }
 0x16d   : > { %v853_v42 = vpop.f32.mrf.mxu1  ;;  %v1129_v23 = vrot.slane %v963_v33, 1  ;;  %v1178_v43 = vrot.slane %v963_v33, 2  ;;  %v1220_v27 = vpack.c.bf16 %v963_v33, %v962_v61 }
 0x16e   : > { %v854_v15 = vadd.f32 %v853_v42, %v801_v14 }
 0x16f   : > { %1460 = vmatmul.bf16.gmra.mxu3 %v1220_v27  ;;  %v1179_v31 = vsel %vm482_vm0, %v1176_v55, %v1178_v43  ;;  %v1130_v3 = vsel %vm431_vm1, %v1127_v10, %v1129_v23 }
 0x170   : > { %v907_v0 = vadd.f32 %v2787_v19, %v854_v15 }
 0x172   : > { %vm929_vm5 = vcmp.ge.f32.partialorder %v907_v0, 0.0  ;;  %v947_v11 = vmul.f32 %v2683_v6, %v907_v0 }
 0x174   : > { %v964_v29 = vsel %vm929_vm5, %v907_v0, %v947_v11 }
 0x175   : > { %v855_v2 = vpop.f32.mrf.mxu1  ;;  %v1180_v4 = vrot.slane %v964_v29, 2  ;;  %v1131_v41 = vrot.slane %v964_v29, 1 }
 0x176   : > { %v856_v28 = vadd.f32 %v855_v2, %v803_v18 }
 0x177   : > { %v1181_v61 = vsel %vm482_vm0, %v1178_v43, %v1180_v4  ;;  %v1132_v54 = vsel %vm431_vm1, %v1129_v23, %v1131_v41  ;;  %v984_v43 = vadd.s32 128, %v2686_v13 }
 0x178   : > { %v909_v55 = vadd.f32 %v2799_v47, %v856_v28  ;;  %v1222_v10 = vpack.c.bf16 %v1181_v61, %v1179_v31  ;;  %v1221_v20 = vpack.c.bf16 %v1132_v54, %v1130_v3 }
 0x179   : > { %vm1018_vm8 = vcmp.lt.s32.totalorder %v984_v43, 129 }
 0x17a   : > { %v948_v19 = vmul.f32 %v2683_v6, %v909_v55  ;;  %1558 = vmatmul.bf16.gmra.mxu0 %v1222_v10  ;;  %vm930_vm6 = vcmp.ge.f32.partialorder %v909_v55, 0.0 }
 0x17c   : > { %v965_v14 = vsel %vm930_vm6, %v909_v55, %v948_v19 }
 0x17d   : > { %v858_v33 = vpop.f32.mrf.mxu1  ;;  %v1133_v42 = vrot.slane %v965_v14, 1  ;;  %v1182_v27 = vrot.slane %v965_v14, 2  ;;  %v1223_v15 = vpack.c.bf16 %v965_v14, %v964_v29 }
 0x17e   : > { %v859_v0 = vadd.f32 %v858_v33, %v806_v39 }
 0x17f   : > { %1465 = vmatmul.bf16.gmra.mxu3 %v1223_v15  ;;  %v1183_v47 = vsel %vm482_vm0, %v1180_v4, %v1182_v27  ;;  %v1134_v23 = vsel %vm431_vm1, %v1131_v41, %v1133_v42 }
 0x180   : > { %v912_v31 = vadd.f32 %v2815_v38, %v859_v0 }
 0x182   : > { %vm931_vm7 = vcmp.ge.f32.partialorder %v912_v31, 0.0  ;;  %v949_v3 = vmul.f32 %v2683_v6, %v912_v31 }
 0x184   : > { %v966_v50 = vsel %vm931_vm7, %v912_v31, %v949_v3 }
 0x185   : > { %v1086_v60 = vsel %vm1018_vm8, %v966_v50, 0.0  ;;  %v860_v11 = vpop.f32.mrf.mxu1 }
 0x186   : > { %v1135_v18 = vrot.slane %v1086_v60, 1  ;;  %v1184_v2 = vrot.slane %v1086_v60, 2 }
 0x188   : > { %v1185_v29 = vsel %vm482_vm0, %v1182_v27, %v1184_v2  ;;  %v1136_v13 = vsel %vm431_vm1, %v1133_v42, %v1135_v18 }
 0x189   : > { %v1225_v28 = vpack.c.bf16 %v1185_v29, %v1183_v47  ;;  %v1224_v61 = vpack.c.bf16 %v1136_v13, %v1134_v23 }
 0x18b   : > { %1563 = vmatmul.bf16.gmra.mxu0 %v1225_v28 }
 0x18f   : > { %1479 = vmatmul.bf16.vlgmr.msrb.gmra.mxu3 %v1203_v16 }
 0x192   : > { %v1431_v44 = vpop.f32.mrf.mxu2 }
 0x19a   : > { %v1433_v30 = vpop.f32.mrf.mxu2 }
 0x19f   : > { %1484 = vmatmul.bf16.gmra.mxu3 %v1206_v1  ;;  %v1529_v1 = vpop.f32.mrf.mxu0 }
 0x1a2   : > { %v1436_v56 = vpop.f32.mrf.mxu2 }
 0x1a7   : > { %v1531_v57 = vpop.f32.mrf.mxu0 }
 0x1aa   : > { %v1438_v41 = vpop.f32.mrf.mxu2 }
 0x1af   : > { %1489 = vmatmul.bf16.gmra.mxu3 %v1209_v7  ;;  %v1534_v63 = vpop.f32.mrf.mxu0 }
 0x1b2   : > { %v1441_v10 = vpop.f32.mrf.mxu2 }
 0x1bf   : > { %1494 = vmatmul.bf16.gmra.mxu3 %v1212_v17 }
 0x1c2   : > { %v1446_v6 = vpop.f32.mrf.mxu3 }
 0x1ca   : > { %v2869_v38 = vpop.f32.mrf.mxu3 }
 0x1cf   : > { %1499 = vmatmul.bf16.gmra.mxu3 %v1215_v46  ;;  %v1536_v46 = vpop.f32.mrf.mxu0 }
 0x1d2   : > { %v2874_v32 = vpop.f32.mrf.mxu3 }
 0x1da   : > { %v2876_v45 = vpop.f32.mrf.mxu3 }
 0x1df   : > { %1504 = vmatmul.bf16.gmra.mxu3 %v1218_v51  ;;  %v1539_v51 = vpop.f32.mrf.mxu0 }
 0x1e2   : > { %v2881_v16 = vpop.f32.mrf.mxu3 }
 0x1e7   : > { %v1541_v54 = vpop.f32.mrf.mxu0 }
 0x1ea   : > { %v2883_v53 = vpop.f32.mrf.mxu3 }
 0x1ef   : > { %1509 = vmatmul.bf16.gmra.mxu3 %v1221_v20  ;;  %v2896_v20 = vld [vmem:[%s3094_s4] ss:$0 sm:$0xff]  ;;  %v1544_v39 = vpop.f32.mrf.mxu0 }
 0x1f0   : > { %v1442_v19 = vadd.f32 %v2896_v20, %v1441_v10  ;;  %v1434_v18 = vadd.f32 %v2896_v20, %v1433_v30  ;;  %v1432_v29 = vadd.f32 %v2896_v20, %v1431_v44  ;;  %v1437_v13 = vadd.f32 %v2896_v20, %v1436_v56 }
 0x1f1   : > { %v1447_v44 = vadd.f32 %v2896_v20, %v1446_v6 }
 0x1f2   : > { %v2885_v62 = vpop.f32.mrf.mxu3 }
 0x1f7   : > { %v1546_v15 = vpop.f32.mrf.mxu0 }
 0x1fa   : > { %v2887_v26 = vpop.f32.mrf.mxu3 }
 0x1ff   : > { %1514 = vmatmul.bf16.gmra.mxu3 %v1224_v61  ;;  %v1549_v43 = vpop.f32.mrf.mxu0  ;;  %v1439_v61 = vadd.f32 %v2896_v20, %v1438_v41 }
 0x202   : > { %v2889_v7 = vpop.f32.mrf.mxu3 }
 0x207   : > { %v1551_v23 = vpop.f32.mrf.mxu0 }
 0x20a   : > { %v2891_v17 = vpop.f32.mrf.mxu3 }
 0x20f   : > { %v1554_v3 = vpop.f32.mrf.mxu0 }
 0x212   : > { %v1480_v52 = vpop.f32.mrf.mxu3 }
 0x217   : > { %v1556_v11 = vpop.f32.mrf.mxu0 }
 0x21a   : > { %v1482_v5 = vpop.f32.mrf.mxu3 }
 0x21b   : > { %v1483_v28 = vadd.f32 %v1482_v5, %v1434_v18 }
 0x222   : > { %v1485_v4 = vpop.f32.mrf.mxu3 }
 0x223   : > { %v1486_v10 = vadd.f32 %v1485_v4, %v1437_v13 }
 0x225   : > { %v2910_v30 = vadd.f32 %v1534_v63, %v1486_v10  ;;  %v2272_v10 = vmov 128.0  }
 0x226   : > { %2169 = vrcp.f32 %v2272_v10 }
 0x22a   : > { %v1487_v55 = vpop.f32.mrf.mxu3 }
 0x22b   : > { %v1488_v40 = vadd.f32 %v1487_v55, %v1439_v61 }
 0x22d   : > { %v2915_v5 = vadd.f32 %v1536_v46, %v1488_v40  ;;  %v1454_v40 = vadd.f32 %v2896_v20, %v2876_v45 }
 0x232   : > { %v1490_v14 = vpop.f32.mrf.mxu3 }
 0x233   : > { %v1491_v33 = vadd.f32 %v1490_v14, %v1442_v19  ;;  %v1443_v19 = vpop.f32.mrf.mxu2  ;;  %v1559_v14 = vpop.f32.mrf.mxu0 }
 0x234   : > { %v1444_v22 = vadd.f32 %v2896_v20, %v1443_v19 }
 0x235   : > { %v2899_v42 = vadd.f32 %v1539_v51, %v1491_v33  ;;  %v1481_v51 = vadd.f32 %v1480_v52, %v1432_v29  ;;  %v2905_v33 = vadd.f32 %v1531_v57, %v1483_v28  ;;  %v1449_v57 = vadd.f32 %v2896_v20, %v2869_v38 }
 0x237   : > { %v2908_v21 = vadd.f32 %v1529_v1, %v1481_v51  ;;  %v1452_v1 = vadd.f32 %v2896_v20, %v2874_v32 }
 0x239   : > { %v1569_v56 = vadd.f32 %v2905_v33, %v2908_v21 }
 0x23a   : > { %v1492_v27 = vpop.f32.mrf.mxu3 }
 0x23b   : > { %v1493_v52 = vadd.f32 %v1492_v27, %v1444_v22  ;;  %v1570_v4 = vadd.f32 %v1569_v56, %v2910_v30  ;;  %v1561_v18 = vpop.f32.mrf.mxu0 }
 0x23d   : > { %v1571_v63 = vadd.f32 %v1570_v4, %v2915_v5  ;;  %v2923_v55 = vadd.f32 %v1541_v54, %v1493_v52 }
 0x23f   : > { %v1572_v22 = vadd.f32 %v1571_v63, %v2899_v42 }
 0x241   : > { %v1573_v32 = vadd.f32 %v1572_v22, %v2923_v55 }
 0x242   : > { %v1495_v0 = vpop.f32.mrf.mxu3 }
 0x243   : > { %v1496_v41 = vadd.f32 %v1495_v0, %v1447_v44  ;;  %v1457_v0 = vadd.f32 %v2896_v20, %v2881_v16 }
 0x245   : > { %v2928_v46 = vadd.f32 %v1544_v39, %v1496_v41  ;;  %v1462_v39 = vadd.f32 %v2896_v20, %v2885_v62  ;;  %v1467_v62 = vadd.f32 %v2896_v20, %v2889_v7 }
 0x247   : > { %v1574_v13 = vadd.f32 %v1573_v32, %v2928_v46 }
 0x24a   : > { %v1497_v47 = vpop.f32.mrf.mxu3 }
 0x24b   : > { %v1498_v6 = vadd.f32 %v1497_v47, %v1449_v57  ;;  %v1459_v47 = vadd.f32 %v2896_v20, %v2883_v53  ;;  %v1469_v57 = vadd.f32 %v2896_v20, %v2891_v17 }
 0x24d   : > { %v2933_v29 = vadd.f32 %v1546_v15, %v1498_v6  ;;  %v1464_v15 = vadd.f32 %v2896_v20, %v2887_v26 }
 0x252   : > { %v1500_v31 = vpop.f32.mrf.mxu3 }
 0x253   : > { %v1501_v38 = vadd.f32 %v1500_v31, %v1452_v1  ;;  %v1575_v31 = vadd.f32 %v1574_v13, %v2933_v29 }
 0x255   : > { %v2938_v45 = vadd.f32 %v1549_v43, %v1501_v38  ;;  %v1564_v43 = vpop.f32.mrf.mxu0 }
 0x25a   : > { %v1502_v50 = vpop.f32.mrf.mxu3 }
 0x25b   : > { %v1503_v54 = vadd.f32 %v1502_v50, %v1454_v40  ;;  %v1576_v50 = vadd.f32 %v1575_v31, %v2938_v45 }
 0x25d   : > { %v2943_v61 = vadd.f32 %v1551_v23, %v1503_v54 }
 0x25f   : > { %v1577_v19 = vadd.f32 %v1576_v50, %v2943_v61 }
 0x262   : > { %v1505_v60 = vpop.f32.mrf.mxu3 }
 0x263   : > { %v1506_v28 = vadd.f32 %v1505_v60, %v1457_v0 }
 0x265   : > { %v2948_v51 = vadd.f32 %v1554_v3, %v1506_v28  ;;  %v2170_v3 = vpop.eup %2169  ;;  %v1598_v28 = vld [vmem:[%s3095_s5] sm:$0xff] }
 0x266   : > { %v1591_v41 = vmul.f32 128.0, %v2170_v3  ;;  %vm1595_vm0 = vweird.f32 %v2170_v3 }
 0x267   : > { %v1578_v44 = vadd.f32 %v1577_v19, %v2948_v51 }
 0x268   : > { %v1592_v22 = vsub.f32 1.0, %v1591_v41 }
 0x26a   : > { %v1507_v2 = vpop.f32.mrf.mxu3 }
 0x26b   : > { %v1508_v16 = vadd.f32 %v1507_v2, %v1459_v47 }
 0x26d   : > { %v2953_v23 = vadd.f32 %v1556_v11, %v1508_v16  ;;  %v2273_v16 = vmov 0  }
 0x26e   : > { %2166 = vset.pattern.permute.xlu0 %v2273_v16 }
 0x272   : > { %v1510_v12 = vpop.f32.mrf.mxu3 }
 0x273   : > { %v1511_v53 = vadd.f32 %v1510_v12, %v1462_v39  ;;  %v1579_v12 = vadd.f32 %v1578_v44, %v2953_v23 }
 0x275   : > { %v2956_v26 = vadd.f32 %v1559_v14, %v1511_v53  ;;  %v1566_v14 = vpop.f32.mrf.mxu0 }
 0x277   : > { %v1580_v7 = vadd.f32 %v1579_v12, %v2956_v26  ;;  %v1618_v12 = vld [vmem:[%s3098_s8] sm:$0x1] }
 0x27a   : > { %v1512_v27 = vpop.f32.mrf.mxu3 }
 0x27b   : > { %v1513_v2 = vadd.f32 %v1512_v27, %v1464_v15  ;;  %v1593_v27 = vmul.f32 %v2170_v3, %v1592_v22  ;;  %v1602_v15 = vld [vmem:[%s3096_s6] sm:$0xff] }
 0x27d   : > { %v2959_v52 = vadd.f32 %v1561_v18, %v1513_v2  ;;  %v1594_v0 = vadd.f32 %v2170_v3, %v1593_v27 }
 0x27f   : > { %v1581_v1 = vadd.f32 %v1580_v7, %v2959_v52  ;;  %v1596_v47 = vsel %vm1595_vm0, %v2170_v3, %v1594_v0 }
 0x282   : > { %v1515_v60 = vpop.f32.mrf.mxu3 }
 0x283   : > { %v1516_v56 = vadd.f32 %v1515_v60, %v1467_v62 }
 0x285   : > { %v2964_v4 = vadd.f32 %v1564_v43, %v1516_v56  ;;  %v1605_v43 = vld [vmem:[%s3097_s7] sm:$0xff] }
 0x287   : > { %v1582_v6 = vadd.f32 %v1581_v1, %v2964_v4 }
 0x28a   : > { %v1517_v11 = vpop.f32.mrf.mxu3 }
 0x28b   : > { %v1518_v63 = vadd.f32 %v1517_v11, %v1469_v57 }
 0x28d   : > { %v2968_v40 = vadd.f32 %v1566_v14, %v1518_v63 }
 0x28f   : > { %v1583_v18 = vadd.f32 %v1582_v6, %v2968_v40 }
 0x291   : > { %v1584_v38 = vrot.slane %v1583_v18, 4 }
 0x293   : > { %v1585_v17 = vadd.f32 %v1584_v38, %v1583_v18 }
 0x295   : > { %v1586_v20 = vrot.slane %v1585_v17, 2 }
 0x297   : > { %v1587_v32 = vadd.f32 %v1586_v20, %v1585_v17 }
 0x299   : > { %v1588_v54 = vrot.slane %v1587_v32, 1 }
 0x29b   : > { %v1589_v13 = vadd.f32 %v1588_v54, %v1587_v32 }
 0x29d   : > { %v1597_v39 = vmul.f32 %v1596_v47, %v1589_v13 }
 0x29f   : > { %v1599_v31 = vmul.f32 %v1598_v28, %v1597_v39 }
 0x2a1   : > { %1600 = vadd.xlane.f32.xlu0 %v1599_v31 }
 0x314   : > { %v1601_v50 = vpop.xlane.xlu0 %1600 }
 0x315   : > { %v1603_v53 = vadd.f32 %v1602_v15, %v1601_v50  ;;  %v3119_v50 = vld [vmem:[#allocation10_spill] sm:$0xff] }
 0x317   : > { %v1604_v10 = vmax.f32 %v1603_v53, 0.0  ;;  %v3120_v53 = vld [vmem:[#allocation11_spill] sm:$0xff] }
 0x319   : > { %1608 = vperm.xlu0 %2166, %v1604_v10   ;;  %v3121_v10 = vld [vmem:[#allocation12_spill] sm:$0xff] }
 0x38b   : > { %v1609_v60 = vpop.permute.xlu0 %1608 }
 0x38c   : > { %v1611_v62 = vmul.f32 %v1609_v60, %v1605_v43 }
 0x38e   : > { %v1612_v19 = vrot.slane %v1611_v62, 4 }
 0x390   : > { %v1613_v2 = vadd.f32 %v1612_v19, %v1611_v62 }
 0x392   : > { %v1614_v44 = vrot.slane %v1613_v2, 2 }
 0x394   : > { %v1615_v56 = vadd.f32 %v1614_v44, %v1613_v2 }
 0x396   : > { %v1616_v3 = vrot.slane %v1615_v56, 1 }
 0x398   : > { %v1617_v57 = vadd.f32 %v1616_v3, %v1615_v56 }
 0x39a   : > { %v1619_v7 = vadd.f32 %v1618_v12, %v1617_v57 }
 0x39c   : > { %v2045_v11 = vmul.f32 -1.442695, %v1619_v7 }
 0x39e   : > { %2171 = vpow2.f32 %v2045_v11 }
 0x3a4   : > { %v2172_v41 = vpop.eup %2171 }
 0x3a5   : > { %v1623_v1 = vadd.f32 1.0, %v2172_v41 }
 0x3a7   : > { %2173 = vrcp.f32 %v1623_v1  ;;  %v1635_v22 = vand.u32 2147483648, %v1623_v1  ;;  %v1633_v38 = vand.u32 2147483647, %v1623_v1  ;;  %vm1629_vm9 = vweird.f32 %v1623_v1 }
 0x3a9   : > { %v1636_v17 = vor.u32 1.1754944e-38, %v1635_v22  ;;  %vm1634_vm11 = vcmp.eq.f32.partialorder %v1633_v38, 8.507059e+37 }
 0x3ad   : > { %v2174_v63 = vpop.eup %2173 }
 0x3ae   : > { %v1625_v14 = vmul.f32 %v2174_v63, %v1623_v1  ;;  %vm1630_vm1 = vweird.f32 %v2174_v63 }
 0x3af   : > { %vm1631_vm10 = vmor %vm1629_vm9, %vm1630_vm1 }
 0x3b0   : > { %v1626_v6 = vsub.f32 1.0, %v1625_v14 }
 0x3b2   : > { %v1627_v18 = vmul.f32 %v2174_v63, %v1626_v6 }
 0x3b4   : > { %v1628_v27 = vadd.f32 %v2174_v63, %v1627_v18 }
 0x3b6   : > { %v1632_v20 = vsel %vm1631_vm10, %v2174_v63, %v1628_v27 }
 0x3b7   : > { %v1637_v0 = vsel %vm1634_vm11, %v1636_v17, %v1632_v20 }
 0x3b8   : > { %v1639_v32 = vperm.slane %v1637_v0, 0  ;;  %1720 = vst [vmem:[%s390_s18] sm:$0x1] %v1637_v0 }
 0x3ba   : > { %v1640_v54 = vmul.f32 %v1639_v32, %v2908_v21  ;;  %v1641_v13 = vmul.f32 %v1639_v32, %v2905_v33  ;;  %v1642_v39 = vmul.f32 %v1639_v32, %v2910_v30  ;;  %v1643_v16 = vmul.f32 %v1639_v32, %v2915_v5 }
 0x3bb   : > { %v1644_v21 = vmul.f32 %v1639_v32, %v2899_v42  ;;  %v1645_v33 = vmul.f32 %v1639_v32, %v2923_v55  ;;  %v1646_v30 = vmul.f32 %v1639_v32, %v2928_v46  ;;  %v1647_v5 = vmul.f32 %v1639_v32, %v2933_v29 }
 0x3bc   : > { %v1656_v47 = vadd.f32 %v1640_v54, %v2483_v35  ;;  %v1657_v28 = vadd.f32 %v1641_v13, %v2486_v36  ;;  %v1658_v31 = vadd.f32 %v1642_v39, %v2508_v48  ;;  %v1659_v15 = vadd.f32 %v1643_v16, %v2511_v49 }
 0x3bd   : > { %v1660_v35 = vadd.f32 %v1644_v21, %v2523_v58  ;;  %v1661_v36 = vadd.f32 %v1645_v33, %v2526_v59  ;;  %v1662_v48 = vadd.f32 %v1646_v30, %v2536_v8  ;;  %v1663_v49 = vadd.f32 %v1647_v5, %v2539_v9 }
 0x3be   : > { %1672 = vxpose.xlu1.b32.start [1/16] %v1656_v47, 128  ;;  %v1648_v42 = vmul.f32 %v1639_v32, %v2938_v45  ;;  %v1649_v55 = vmul.f32 %v1639_v32, %v2943_v61  ;;  %v1650_v46 = vmul.f32 %v1639_v32, %v2948_v51  ;;  %v1651_v29 = vmul.f32 %v1639_v32, %v2953_v23  ;;  %v3118_v45 = vld [vmem:[#allocation9_spill] sm:$0xff] }
 0x3c0   : > { %v1664_v58 = vadd.f32 %v1648_v42, %v2548_v24  ;;  %v1665_v59 = vadd.f32 %v1649_v55, %v2551_v25  ;;  %v1666_v8 = vadd.f32 %v1650_v46, %v2560_v34  ;;  %v1667_v9 = vadd.f32 %v1651_v29, %v2563_v37 }
 0x3c1   : > { %v1652_v24 = vmul.f32 %v1639_v32, %v2956_v26  ;;  %v1653_v25 = vmul.f32 %v1639_v32, %v2959_v52  ;;  %v1654_v34 = vmul.f32 %v1639_v32, %v2964_v4  ;;  %v1655_v37 = vmul.f32 %v1639_v32, %v2968_v40 }
 0x3c3   : > { %v1668_v61 = vadd.f32 %v1652_v24, %v3118_v45  ;;  %v1669_v51 = vadd.f32 %v1653_v25, %v3119_v50  ;;  %v1670_v23 = vadd.f32 %v1654_v34, %v3120_v53  ;;  %v1671_v43 = vadd.f32 %v1655_v37, %v3121_v10 }
 0x3c6   : > { %1673 = vxpose.xlu1.b32.cont [2/16] %v1657_v28, 128 }
 0x3ce   : > { %1674 = vxpose.xlu1.b32.cont [3/16] %v1658_v31, 128 }
 0x3d6   : > { %1675 = vxpose.xlu1.b32.cont [4/16] %v1659_v15, 128 }
 0x3de   : > { %1676 = vxpose.xlu1.b32.cont [5/16] %v1660_v35, 128 }
 0x3e6   : > { %1677 = vxpose.xlu1.b32.cont [6/16] %v1661_v36, 128 }
 0x3ee   : > { %1678 = vxpose.xlu1.b32.cont [7/16] %v1662_v48, 128 }
 0x3f6   : > { %1679 = vxpose.xlu1.b32.cont [8/16] %v1663_v49, 128 }
 0x3fe   : > { %1680 = vxpose.xlu1.b32.cont [9/16] %v1664_v58, 128 }
 0x406   : > { %1681 = vxpose.xlu1.b32.cont [10/16] %v1665_v59, 128 }
 0x40e   : > { %1682 = vxpose.xlu1.b32.cont [11/16] %v1666_v8, 128 }
 0x416   : > { %1683 = vxpose.xlu1.b32.cont [12/16] %v1667_v9, 128 }
 0x41e   : > { %1684 = vxpose.xlu1.b32.cont [13/16] %v1668_v61, 128 }
 0x426   : > { %1685 = vxpose.xlu1.b32.cont [14/16] %v1669_v51, 128 }
 0x42e   : > { %1686 = vxpose.xlu1.b32.cont [15/16] %v1670_v23, 128 }
 0x436   : > { %1687 = vxpose.xlu1.b32.end [16/16] %v1671_v43, 128 }
 0x462   : > { %v1688_v26 = vpop.trf.xlu1 }
 0x463   : > { %2202 = shalt.err (!%p2199_p3)
}
 0x464   : > { %2118 = dma.vmem_to_hbm [thread:$0]  (%p2377_p5), %s1755_s26, 16, %s1757_s13, %s1727_s14  }
 0x465   : > { %s3039_s18 = scalar_lea.vmem [#allocation3], %s1848_s23  ;;  %s2099_s0 = sshll.u32 %s2360_s9, 7 }
 0x466   : > { %1704 = vst [vmem:[%s3039_s18] sm:$0xff] %v1688_v26  ;;  %s1737_s23 = scalar_lea.hbm %s3100_s10, %s2099_s0  ;;  %s1738_s12 = sshll.u32 %s3039_s18, 4  ;;  %s1739_s12 = int_to_ptr.vmem [resolvable:$true] %s1738_s12 }
 0x467   : > { %s1740_s26 = sshll.u32 %s1737_s23, 4  ;;  %s1722_s13 = scalar_lea.sflag [#allocation4], %s2984_s15  ;;  %s1741_s26 = int_to_ptr.hbm [resolvable:$true] %s1740_s26 }
 0x468   : > { %s2217_s14 = sshra.s32 %s1741_s26, 4  ;;  %s2223_s25 = scalar_lea.hbm %s3100_s10, 256  ;;  %s2218_s14 = int_to_ptr.hbm [resolvable:$true] %s2217_s14 }
 0x469   : > { %s2219_s16 = scalar_lea.hbm %s2218_s14, 128  ;;  %p2224_p9 = scmp.lt.s32.totalorder %s2218_s14, %s3100_s10 }
 0x46a   : > { %v1689_v52 = vpop.trf.xlu1  ;;  %p2220_p4 = scmp.ne.s32.totalorder %s2218_s14, %s2219_s16  ;;  %p2225_p10 = scmp.lt.s32.totalorder %s2223_s25, %s2219_s16 }
 0x46b   : > { %1705 = vst [vmem:[%s3039_s18 + $0x8] sm:$0xff] %v1689_v52 }
 0x46c   : > { %p2221_p7 = pnand %p2220_p4, %p2377_p5  ;;  %p2226_p11 = por %p2225_p10, %p2224_p9 }
 0x46e   : > { %p2222_p8 = pneg %p2221_p7 }
 0x470   : > { %p2227_p12 = pnand %p2226_p11, %p2222_p8 }
 0x472   : > { %v1690_v4 = vpop.trf.xlu1 }
 0x473   : > { %1706 = vst [vmem:[%s3039_s18 + $0x10] sm:$0xff] %v1690_v4 }
 0x47a   : > { %v1691_v40 = vpop.trf.xlu1 }
 0x47b   : > { %1707 = vst [vmem:[%s3039_s18 + $0x18] sm:$0xff] %v1691_v40 }
 0x482   : > { %v1692_v60 = vpop.trf.xlu1 }
 0x483   : > { %1708 = vst [vmem:[%s3039_s18 + $0x20] sm:$0xff] %v1692_v60 }
 0x48a   : > { %v1693_v62 = vpop.trf.xlu1 }
 0x48b   : > { %1709 = vst [vmem:[%s3039_s18 + $0x28] sm:$0xff] %v1693_v62 }
 0x492   : > { %v1694_v19 = vpop.trf.xlu1 }
 0x493   : > { %1710 = vst [vmem:[%s3039_s18 + $0x30] sm:$0xff] %v1694_v19 }
 0x49a   : > { %v1695_v2 = vpop.trf.xlu1 }
 0x49b   : > { %1711 = vst [vmem:[%s3039_s18 + $0x38] sm:$0xff] %v1695_v2 }
 0x4a2   : > { %v1696_v44 = vpop.trf.xlu1 }
 0x4a3   : > { %1712 = vst [vmem:[%s3039_s18 + $0x40] sm:$0xff] %v1696_v44 }
 0x4aa   : > { %v1697_v56 = vpop.trf.xlu1 }
 0x4ab   : > { %1713 = vst [vmem:[%s3039_s18 + $0x48] sm:$0xff] %v1697_v56 }
 0x4b2   : > { %v1698_v3 = vpop.trf.xlu1 }
 0x4b3   : > { %1714 = vst [vmem:[%s3039_s18 + $0x50] sm:$0xff] %v1698_v3 }
 0x4ba   : > { %v1699_v12 = vpop.trf.xlu1 }
 0x4bb   : > { %1715 = vst [vmem:[%s3039_s18 + $0x58] sm:$0xff] %v1699_v12 }
 0x4c2   : > { %v1700_v57 = vpop.trf.xlu1 }
 0x4c3   : > { %1716 = vst [vmem:[%s3039_s18 + $0x60] sm:$0xff] %v1700_v57 }
 0x4ca   : > { %v1701_v7 = vpop.trf.xlu1 }
 0x4cb   : > { %1717 = vst [vmem:[%s3039_s18 + $0x68] sm:$0xff] %v1701_v7 }
 0x4d2   : > { %v1702_v11 = vpop.trf.xlu1 }
 0x4d3   : > { %1718 = vst [vmem:[%s3039_s18 + $0x70] sm:$0xff] %v1702_v11 }
 0x4da   : > { %v1703_v41 = vpop.trf.xlu1 }
 0x4db   : > { %1719 = vst [vmem:[%s3039_s18 + $0x78] sm:$0xff] %v1703_v41 }
 0x4dc   : > { %2230 = shalt.err (!%p2227_p12)
}
 0x4dd   : > { %s2274_s15 = smov 128   ;;  %s2275_s18 = smov 8  }
 0x4de   : > { %2117 = dma.vmem_to_hbm [thread:$0]  (%p2377_p5), %s1739_s12, 2048, %s1741_s26, %s1722_s13, %s2274_s15, %s2274_s15, %s2275_s18  }
 0x4df PF: > { %p2128_p13 = scmp.ge.s32.totalorder %s2269_s22, 2  ;;  %s1768_s1 = sand.u32 1, %s2257_s19  }
 0x4e0   : > { %s1769_s2 = scalar_lea.sflag [#allocation4], %s1768_s1 }
 0x4e1   : > { %p2122_p0 = pnand %p2128_p13, %p2381_p6 }
 0x4e3   : > { %p2123_p1 = pneg %p2122_p0 }
 0x4e5   : > { %2248 = dma.done.wait (%p2123_p1), %s1769_s2, 2048  }
 0x4e6   : > { %2250 = vsyncadd (%p2123_p1), %s1769_s2, 4294965248  ;;  %s1779_s23 = scalar_lea.sflag [#allocation6], %s1768_s1 }
 0x4e7   : > { %2252 = dma.done.wait (%p2123_p1), %s1779_s23, 16  }
 0x4e8   : > { %2254 = vsyncadd (%p2123_p1), %s1779_s23, 4294967280  ;;  %p26_p5 = scmp.ge.s32.totalorder %s2364_s24, 4   ;;  %s3122_s19 = smov %s2261_s20 }
 0x4e9   : > { %s3123_s20 = smov %s2265_s21  ;;  %s3124_s21 = smov %s2375_s27 }
 0x4ea   : > { %s3125_s22 = smov %s2364_s24  ;;  %28 = sbr.rel (!%p26_p5) target bundleno = 10 (0xa), region = 112 }
 0x4ef   :  { %1784 = vsyncpa [#allocation4], 1 }
 0x4f0   :  { %1786 = vsyncpa [#allocation4 + $0x1], 1 }
 0x4f1   :  { %1787 = vsyncpa [#allocation6], 1 }
 0x4f2   :  { %1789 = vsyncpa [#allocation6 + $0x1], 1 }

</bundles_post_ra>
